<compile_context>
chip_gen: v5e
topology: v5e:2x2
jax: 0.10.0
libtpu: 0.0.40
codegen_flags: <defaults>
</compile_context>

<pallas_src>
import math

import jax
import jax.numpy as jnp
from jax.experimental import pallas as pl


# --------------------------------------------------------------------------
# Config (small, self-consistent BERT)
# --------------------------------------------------------------------------
BATCH = 2
SEQ = 8
HIDDEN = 32
NUM_HEADS = 2
HEAD_DIM = HIDDEN // NUM_HEADS
INTERMEDIATE = 64
NUM_LAYERS = 2
VOCAB = 128
TYPE_VOCAB = 2
MAX_POS = 16
NUM_LABELS = 3
NUM_RFS = 16
DOWN_SAMPLE = 8
LN_EPS = 1e-12
LANE = 128  # lane-dense padding width

# Python-float compile-time constants (used only at pack time).
ATTN_SCALE = 1.0 / math.sqrt(float(HEAD_DIM))
ADAPTER_SCALE = 1.0 / math.sqrt(float(NUM_RFS))

# ---- per-layer weight-slab row offsets (slab shape: (NUM_LAYERS, W_ROWS, 128))
W_QKV = 0                        # (HIDDEN, 3*HIDDEN)  fused QKV (Q pre-scaled)
W_AO = W_QKV + HIDDEN            # (HIDDEN, HIDDEN)    attention output dense
W_AAD = W_AO + HIDDEN            # (HIDDEN, NUM_RFS)   attn adapter (dw @ om)
W_AUP = W_AAD + HIDDEN           # (NUM_RFS, HIDDEN)   attn adapter up (scaled)
W_INT = W_AUP + NUM_RFS          # (HIDDEN, INTERMEDIATE)
W_OUT = W_INT + HIDDEN           # (INTERMEDIATE, HIDDEN)
W_OAD = W_OUT + INTERMEDIATE     # (HIDDEN, NUM_RFS)   out adapter (dw @ om)
W_OUP = W_OAD + HIDDEN           # (NUM_RFS, HIDDEN)   out adapter up (scaled)
W_ROWS = W_OUP + NUM_RFS         # = 256

# ---- bias/LN slab row offsets (slab shape: (B_ROWS, 128))
B_EMB_G, B_EMB_B, B_POOL, B_CLS = 0, 1, 2, 3
B_GLOBAL = 4
(BL_QKV, BL_AO, BL_AAD, BL_AUP, BL_ALN_G, BL_ALN_B,
 BL_INT, BL_OUT, BL_OAD, BL_OUP, BL_OLN_G, BL_OLN_B) = range(12)
B_PER_LAYER = 12
B_ROWS_RAW = B_GLOBAL + NUM_LAYERS * B_PER_LAYER   # 28
B_ROWS = 32                                        # pad to sublane multiple

# ---- pooler/classifier slab row offsets (slab shape: (2*HIDDEN, 128))
G_POOL = 0
G_CLS = HIDDEN


# --------------------------------------------------------------------------
# Fused Pallas kernel: whole encoder + pooler + classifier
# --------------------------------------------------------------------------
def _bert_fused_kernel(emb_ref, mask_ref, wslab_ref, bslab_ref, gslab_ref,
                       logits_ref):
    def brow(r, cols):
        return bslab_ref[r:r + 1, 0:cols]                  # (1, cols)

    def layernorm(z, g, b):
        mu = jnp.mean(z, axis=-1, keepdims=True)
        var = jnp.mean((z - mu) * (z - mu), axis=-1, keepdims=True)
        return (z - mu) * jax.lax.rsqrt(var + LN_EPS) * g + b

    def relu_adapter(x, w, b, uw, ub):
        # down-proj already folded with Omega; 1/sqrt(num_rfs) folded into uw.
        phi = jnp.maximum(
            jnp.dot(x, w, preferred_element_type=jnp.float32) + b, 0.0)
        return x + jnp.dot(phi, uw, preferred_element_type=jnp.float32) + ub

    # --- embeddings LayerNorm (embedding sum computed in wrapper) ---
    x = layernorm(emb_ref[...], brow(B_EMB_G, HIDDEN), brow(B_EMB_B, HIDDEN))

    # --- attention mask: hoist the (S, S) broadcast once (layer-invariant) ---
    add_mask = mask_ref[...]                               # (B, S)
    mask_full = [jnp.broadcast_to(add_mask[b:b + 1, :], (SEQ, SEQ))
                 for b in range(BATCH)]

    # --- encoder layers (unrolled: NUM_LAYERS = 2) ---
    for l in range(NUM_LAYERS):
        bo = B_GLOBAL + l * B_PER_LAYER

        # Fused QKV projection (Q columns pre-scaled by 1/sqrt(head_dim)).
        qkv = jnp.dot(x, wslab_ref[l, W_QKV:W_QKV + HIDDEN, 0:3 * HIDDEN],
                      preferred_element_type=jnp.float32) \
            + brow(bo + BL_QKV, 3 * HIDDEN)
        q = qkv[:, 0 * HIDDEN:1 * HIDDEN]
        k = qkv[:, 1 * HIDDEN:2 * HIDDEN]
        v = qkv[:, 2 * HIDDEN:3 * HIDDEN]

        # Self-attention: per (batch, head); context assembled with concatenate
        # (stays in vregs — no masked scratch stores).
        ctx_rows = []
        for b in range(BATCH):
            r0 = b * SEQ
            heads = []
            for h in range(NUM_HEADS):
                c0 = h * HEAD_DIM
                q_bh = q[r0:r0 + SEQ, c0:c0 + HEAD_DIM]    # (S, Dh)
                k_bh = k[r0:r0 + SEQ, c0:c0 + HEAD_DIM]
                v_bh = v[r0:r0 + SEQ, c0:c0 + HEAD_DIM]
                s = jax.lax.dot_general(
                    q_bh, k_bh, (((1,), (1,)), ((), ())),
                    preferred_element_type=jnp.float32)    # (S, S)
                s = s + mask_full[b]
                s = s - jnp.max(s, axis=-1, keepdims=True)
                p = jnp.exp(s)
                p = p * pl.reciprocal(jnp.sum(p, axis=-1, keepdims=True),
                                      approx=True)
                heads.append(jnp.dot(p, v_bh,
                                     preferred_element_type=jnp.float32))
            ctx_rows.append(jnp.concatenate(heads, axis=1))  # (S, HIDDEN)
        ctx = jnp.concatenate(ctx_rows, axis=0)              # (BS, HIDDEN)

        # Attention self-output: dense -> (dropout=id) -> mh_adapter -> add&LN
        h_so = jnp.dot(ctx, wslab_ref[l, W_AO:W_AO + HIDDEN, 0:HIDDEN],
                       preferred_element_type=jnp.float32) \
            + brow(bo + BL_AO, HIDDEN)
        h_so = relu_adapter(
            h_so,
            wslab_ref[l, W_AAD:W_AAD + HIDDEN, 0:NUM_RFS],
            brow(bo + BL_AAD, NUM_RFS),
            wslab_ref[l, W_AUP:W_AUP + NUM_RFS, 0:HIDDEN],
            brow(bo + BL_AUP, HIDDEN))
        attn_out = layernorm(h_so + x, brow(bo + BL_ALN_G, HIDDEN),
                             brow(bo + BL_ALN_B, HIDDEN))

        # Feed-forward: intermediate(gelu) -> dense -> adapter -> add&LN
        inter = jnp.dot(attn_out,
                        wslab_ref[l, W_INT:W_INT + HIDDEN, 0:INTERMEDIATE],
                        preferred_element_type=jnp.float32) \
            + brow(bo + BL_INT, INTERMEDIATE)
        inter = 0.5 * inter * (1.0 + jnp.tanh(
            0.7978845608028654 * (inter + 0.044715 * inter * inter * inter)))
        h_ff = jnp.dot(inter,
                       wslab_ref[l, W_OUT:W_OUT + INTERMEDIATE, 0:HIDDEN],
                       preferred_element_type=jnp.float32) \
            + brow(bo + BL_OUT, HIDDEN)
        h_ff = relu_adapter(
            h_ff,
            wslab_ref[l, W_OAD:W_OAD + HIDDEN, 0:NUM_RFS],
            brow(bo + BL_OAD, NUM_RFS),
            wslab_ref[l, W_OUP:W_OUP + NUM_RFS, 0:HIDDEN],
            brow(bo + BL_OUP, HIDDEN))
        x = layernorm(h_ff + attn_out, brow(bo + BL_OLN_G, HIDDEN),
                      brow(bo + BL_OLN_B, HIDDEN))

    # --- pooler + classifier (computed for every row; wrapper picks CLS rows;
    #     classifier is padded to 128 columns so the store is lane-dense) ---
    pooled = jnp.tanh(
        jnp.dot(x, gslab_ref[G_POOL:G_POOL + HIDDEN, 0:HIDDEN],
                preferred_element_type=jnp.float32) + brow(B_POOL, HIDDEN))
    logits_ref[...] = jnp.dot(
        pooled, gslab_ref[G_CLS:G_CLS + HIDDEN, 0:LANE],
        preferred_element_type=jnp.float32) + brow(B_CLS, LANE)


# --------------------------------------------------------------------------
# Parameter init (deterministic, synthetic; raw per-module parameters)
# --------------------------------------------------------------------------
def init_params(key):
    keys = iter(jax.random.split(key, 128))

    def w_init(shape, scale=0.02):
        return jax.random.normal(next(keys), shape, jnp.float32) * scale

    def stacked(shape, scale=0.02):
        return jnp.stack([w_init(shape, scale) for _ in range(NUM_LAYERS)])

    return {
        "word_emb": w_init((VOCAB, HIDDEN)),
        "pos_emb": w_init((MAX_POS, HIDDEN)),
        "type_emb": w_init((TYPE_VOCAB, HIDDEN)),
        "emb_ln_g": jnp.ones((1, HIDDEN), jnp.float32),
        "emb_ln_b": jnp.zeros((1, HIDDEN), jnp.float32),
        # fused QKV (concat of q, k, v projections along the output dim)
        "qkv_w": stacked((HIDDEN, 3 * HIDDEN)),
        "qkv_b": stacked((1, 3 * HIDDEN)),
        "ao_w": stacked((HIDDEN, HIDDEN)),
        "ao_b": stacked((1, HIDDEN)),
        # attention (mh) adapter
        "a_dw": stacked((HIDDEN, DOWN_SAMPLE)),
        "a_db": stacked((1, DOWN_SAMPLE)),
        "a_om": stacked((DOWN_SAMPLE, NUM_RFS), scale=1.0),
        "a_uw": stacked((NUM_RFS, HIDDEN)),
        "a_ub": stacked((1, HIDDEN)),
        "a_ln_g": jnp.ones((NUM_LAYERS, 1, HIDDEN), jnp.float32),
        "a_ln_b": jnp.zeros((NUM_LAYERS, 1, HIDDEN), jnp.float32),
        # feed-forward
        "int_w": stacked((HIDDEN, INTERMEDIATE)),
        "int_b": stacked((1, INTERMEDIATE)),
        "out_w": stacked((INTERMEDIATE, HIDDEN)),
        "out_b": stacked((1, HIDDEN)),
        # output adapter
        "o_dw": stacked((HIDDEN, DOWN_SAMPLE)),
        "o_db": stacked((1, DOWN_SAMPLE)),
        "o_om": stacked((DOWN_SAMPLE, NUM_RFS), scale=1.0),
        "o_uw": stacked((NUM_RFS, HIDDEN)),
        "o_ub": stacked((1, HIDDEN)),
        "o_ln_g": jnp.ones((NUM_LAYERS, 1, HIDDEN), jnp.float32),
        "o_ln_b": jnp.zeros((NUM_LAYERS, 1, HIDDEN), jnp.float32),
        # pooler + classifier
        "pool_w": w_init((HIDDEN, HIDDEN)),
        "pool_b": w_init((1, HIDDEN)),
        "cls_w": w_init((HIDDEN, NUM_LABELS)),
        "cls_b": w_init((1, NUM_LABELS)),
    }


# --------------------------------------------------------------------------
# Pack raw params into 3 contiguous lane-dense slabs (done once, offline)
# --------------------------------------------------------------------------
def pack_params(p):
    def pad_cols(m):
        return jnp.pad(m.astype(jnp.float32), ((0, 0), (0, LANE - m.shape[1])))

    # Fold attention scale into Q columns of the fused QKV projection.
    qkv_scale = jnp.concatenate(
        [jnp.full((HIDDEN,), ATTN_SCALE, jnp.float32),
         jnp.ones((2 * HIDDEN,), jnp.float32)])[None, :]

    wslab_layers, bias_rows = [], []
    # global bias/LN rows
    bias_rows += [pad_cols(p["emb_ln_g"]), pad_cols(p["emb_ln_b"]),
                  pad_cols(p["pool_b"]), pad_cols(p["cls_b"])]

    for l in range(NUM_LAYERS):
        qkv_w = p["qkv_w"][l] * qkv_scale
        qkv_b = p["qkv_b"][l] * qkv_scale
        # Fold adapter down-proj into Omega; fold 1/sqrt(num_rfs) into up-proj.
        a_W = p["a_dw"][l] @ p["a_om"][l]
        a_b = p["a_db"][l] @ p["a_om"][l]
        a_uw = p["a_uw"][l] * ADAPTER_SCALE
        o_W = p["o_dw"][l] @ p["o_om"][l]
        o_b = p["o_db"][l] @ p["o_om"][l]
        o_uw = p["o_uw"][l] * ADAPTER_SCALE

        wslab_layers.append(jnp.concatenate(
            [pad_cols(m) for m in
             (qkv_w, p["ao_w"][l], a_W, a_uw,
              p["int_w"][l], p["out_w"][l], o_W, o_uw)], axis=0))

        bias_rows += [pad_cols(m) for m in
                      (qkv_b, p["ao_b"][l], a_b, p["a_ub"][l],
                       p["a_ln_g"][l], p["a_ln_b"][l],
                       p["int_b"][l], p["out_b"][l],
                       o_b, p["o_ub"][l],
                       p["o_ln_g"][l], p["o_ln_b"][l])]

    wslab = jnp.stack(wslab_layers)                         # (L, W_ROWS, 128)
    assert wslab.shape == (NUM_LAYERS, W_ROWS, LANE)

    bslab = jnp.concatenate(bias_rows, axis=0)              # (28, 128)
    bslab = jnp.pad(bslab, ((0, B_ROWS - bslab.shape[0]), (0, 0)))

    gslab = jnp.concatenate([pad_cols(p["pool_w"]),
                             pad_cols(p["cls_w"])], axis=0)  # (64, 128)

    return {
        "word_emb": p["word_emb"], "pos_emb": p["pos_emb"],
        "type_emb": p["type_emb"],
        "wslab": wslab, "bslab": bslab, "gslab": gslab,
    }


# --------------------------------------------------------------------------
# Forward pass: embedding gather (XLA glue) + one fused Pallas kernel
# --------------------------------------------------------------------------
def forward(packed, input_ids, attention_mask, token_type_ids):
    # Embedding gathers are glue (no clean tiny-Pallas equivalent); LN and all
    # other compute happen inside the fused kernel.
    we = packed["word_emb"][input_ids]                      # (B, S, H)
    pe = packed["pos_emb"][jnp.arange(SEQ)][None, :, :]     # (1, S, H)
    te = packed["type_emb"][token_type_ids]                 # (B, S, H)
    emb = (we + pe + te).reshape(BATCH * SEQ, HIDDEN)       # (B*S, H)

    # Additive attention mask over keys, (B, S).
    add_mask = (1.0 - attention_mask.astype(jnp.float32)) * -1e9

    logits_all = pl.pallas_call(
        _bert_fused_kernel,
        out_shape=jax.ShapeDtypeStruct((BATCH * SEQ, LANE), jnp.float32),
        # NOTE: no grid — the whole model (<1 MiB) fits in VMEM in a single
        # invocation; only 5 input DMAs (emb, mask, 3 parameter slabs).
        # For larger batch/seq, add a "parallel" grid over row tiles of B*S
        # (uses both TensorCores on v7x) and re-budget against 64 MiB VMEM.
    )(emb, add_mask, packed["wslab"], packed["bslab"], packed["gslab"])

    # CLS token rows (row b*SEQ for each batch element); real label columns.
    return logits_all[0::SEQ, :NUM_LABELS]


# --------------------------------------------------------------------------
# Main
# --------------------------------------------------------------------------
if __name__ == "__main__":
    key = jax.random.PRNGKey(0)
    kp, ki, kt = jax.random.split(key, 3)

    params = init_params(kp)
    packed = pack_params(params)

    input_ids = jax.random.randint(ki, (BATCH, SEQ), 0, VOCAB, dtype=jnp.int32)
    token_type_ids = jax.random.randint(kt, (BATCH, SEQ), 0, TYPE_VOCAB,
                                        dtype=jnp.int32)
    attention_mask = jnp.ones((BATCH, SEQ), jnp.int32)

    fwd = jax.jit(forward)
    logits = fwd(packed, input_ids, attention_mask, token_type_ids)
    jax.block_until_ready(logits)

    assert logits.shape == (BATCH, NUM_LABELS)
    assert bool(jnp.all(jnp.isfinite(logits)))
    print("KERNEL_OK")
</pallas_src>

<mosaic_0001>
module attributes {stable_mosaic.version = 11 : i64} {
  func.func @_bert_fused_kernel(%arg0: memref<16x32xf32, #tpu.memory_space<vmem>>, %arg1: memref<2x8xf32, #tpu.memory_space<vmem>>, %arg2: memref<2x256x128xf32, #tpu.memory_space<vmem>>, %arg3: memref<32x128xf32, #tpu.memory_space<vmem>>, %arg4: memref<64x128xf32, #tpu.memory_space<vmem>>, %arg5: memref<16x128xf32, #tpu.memory_space<vmem>>) attributes {dimension_semantics = [], scalar_prefetch = 0 : i64, scratch_operands = 0 : i64, tpu.core_type = #tpu.core_type<tc>} {
    %c0 = arith.constant 0 : index
    %c0_0 = arith.constant 0 : index
    %0 = vector.load %arg0[%c0, %c0_0] : memref<16x32xf32, #tpu.memory_space<vmem>>, vector<16x32xf32>
    %c0_1 = arith.constant 0 : index
    %c0_2 = arith.constant 0 : index
    %1 = vector.load %arg3[%c0_1, %c0_2] : memref<32x128xf32, #tpu.memory_space<vmem>>, vector<1x32xf32>
    %c1 = arith.constant 1 : index
    %c0_3 = arith.constant 0 : index
    %2 = vector.load %arg3[%c1, %c0_3] : memref<32x128xf32, #tpu.memory_space<vmem>>, vector<1x32xf32>
    %cst = arith.constant dense<0.000000e+00> : vector<16xf32>
    %3 = vector.multi_reduction <add>, %0, %cst [1] : vector<16x32xf32> to vector<16xf32>
    %4 = vector.shape_cast %3 : vector<16xf32> to vector<16x1xf32>
    %cst_4 = arith.constant 3.200000e+01 : f32
    %5 = vector.broadcast %cst_4 : f32 to vector<16x1xf32>
    %6 = arith.divf %4, %5 : vector<16x1xf32>
    %7 = vector.broadcast %6 : vector<16x1xf32> to vector<16x32xf32>
    %8 = arith.subf %0, %7 : vector<16x32xf32>
    %9 = vector.broadcast %6 : vector<16x1xf32> to vector<16x32xf32>
    %10 = arith.subf %0, %9 : vector<16x32xf32>
    %11 = arith.mulf %8, %10 : vector<16x32xf32>
    %cst_5 = arith.constant dense<0.000000e+00> : vector<16xf32>
    %12 = vector.multi_reduction <add>, %11, %cst_5 [1] : vector<16x32xf32> to vector<16xf32>
    %13 = vector.shape_cast %12 : vector<16xf32> to vector<16x1xf32>
    %cst_6 = arith.constant 3.200000e+01 : f32
    %14 = vector.broadcast %cst_6 : f32 to vector<16x1xf32>
    %15 = arith.divf %13, %14 : vector<16x1xf32>
    %16 = vector.broadcast %6 : vector<16x1xf32> to vector<16x32xf32>
    %17 = arith.subf %0, %16 : vector<16x32xf32>
    %cst_7 = arith.constant 9.99999996E-13 : f32
    %18 = vector.broadcast %cst_7 : f32 to vector<16x1xf32>
    %19 = arith.addf %15, %18 : vector<16x1xf32>
    %20 = math.rsqrt %19 : vector<16x1xf32>
    %21 = vector.broadcast %20 : vector<16x1xf32> to vector<16x32xf32>
    %22 = arith.mulf %17, %21 : vector<16x32xf32>
    %23 = vector.broadcast %1 : vector<1x32xf32> to vector<16x32xf32>
    %24 = arith.mulf %22, %23 : vector<16x32xf32>
    %25 = vector.broadcast %2 : vector<1x32xf32> to vector<16x32xf32>
    %26 = arith.addf %24, %25 : vector<16x32xf32>
    %c0_8 = arith.constant 0 : index
    %c0_9 = arith.constant 0 : index
    %27 = vector.load %arg1[%c0_8, %c0_9] : memref<2x8xf32, #tpu.memory_space<vmem>>, vector<2x8xf32>
    %28 = vector.extract_strided_slice %27 {offsets = [0, 0], sizes = [1, 8], strides = [1, 1]} : vector<2x8xf32> to vector<1x8xf32>
    %29 = vector.shape_cast %28 : vector<1x8xf32> to vector<1x8xf32>
    %30 = vector.broadcast %29 : vector<1x8xf32> to vector<8x8xf32>
    %31 = vector.extract_strided_slice %27 {offsets = [1, 0], sizes = [1, 8], strides = [1, 1]} : vector<2x8xf32> to vector<1x8xf32>
    %32 = vector.shape_cast %31 : vector<1x8xf32> to vector<1x8xf32>
    %33 = vector.broadcast %32 : vector<1x8xf32> to vector<8x8xf32>
    %c0_10 = arith.constant 0 : index
    %c0_11 = arith.constant 0 : index
    %c0_12 = arith.constant 0 : index
    %34 = vector.load %arg2[%c0_10, %c0_11, %c0_12] : memref<2x256x128xf32, #tpu.memory_space<vmem>>, vector<1x32x96xf32>
    %35 = vector.shape_cast %34 : vector<1x32x96xf32> to vector<32x96xf32>
    %cst_13 = arith.constant dense<0.000000e+00> : vector<16x96xf32>
    %36 = tpu.matmul %26, %35, %cst_13 {dimension_numbers = #tpu.dot_dimension_numbers<[1], [0], [0], [1], [0, 0, 1, 1], [], []>} : vector<16x32xf32>, vector<32x96xf32>, vector<16x96xf32> -> vector<16x96xf32>
    %c4 = arith.constant 4 : index
    %c0_14 = arith.constant 0 : index
    %37 = vector.load %arg3[%c4, %c0_14] : memref<32x128xf32, #tpu.memory_space<vmem>>, vector<1x96xf32>
    %38 = vector.broadcast %37 : vector<1x96xf32> to vector<16x96xf32>
    %39 = arith.addf %36, %38 : vector<16x96xf32>
    %40 = vector.extract_strided_slice %39 {offsets = [0, 0], sizes = [16, 32], strides = [1, 1]} : vector<16x96xf32> to vector<16x32xf32>
    %41 = vector.extract_strided_slice %39 {offsets = [0, 32], sizes = [16, 32], strides = [1, 1]} : vector<16x96xf32> to vector<16x32xf32>
    %42 = vector.extract_strided_slice %39 {offsets = [0, 64], sizes = [16, 32], strides = [1, 1]} : vector<16x96xf32> to vector<16x32xf32>
    %43 = vector.extract_strided_slice %40 {offsets = [0, 0], sizes = [8, 16], strides = [1, 1]} : vector<16x32xf32> to vector<8x16xf32>
    %44 = vector.extract_strided_slice %41 {offsets = [0, 0], sizes = [8, 16], strides = [1, 1]} : vector<16x32xf32> to vector<8x16xf32>
    %45 = vector.extract_strided_slice %42 {offsets = [0, 0], sizes = [8, 16], strides = [1, 1]} : vector<16x32xf32> to vector<8x16xf32>
    %cst_15 = arith.constant dense<0.000000e+00> : vector<8x8xf32>
    %46 = tpu.matmul %43, %44, %cst_15 {dimension_numbers = #tpu.dot_dimension_numbers<[1], [1], [0], [0], [0, 0, 1, 0], [], []>} : vector<8x16xf32>, vector<8x16xf32>, vector<8x8xf32> -> vector<8x8xf32>
    %47 = arith.addf %46, %30 : vector<8x8xf32>
    %cst_16 = arith.constant dense<0xFF800000> : vector<8xf32>
    %48 = vector.multi_reduction <maximumf>, %47, %cst_16 [1] : vector<8x8xf32> to vector<8xf32>
    %49 = vector.shape_cast %48 : vector<8xf32> to vector<8x1xf32>
    %50 = vector.broadcast %49 : vector<8x1xf32> to vector<8x8xf32>
    %51 = arith.subf %47, %50 : vector<8x8xf32>
    %52 = math.exp %51 : vector<8x8xf32>
    %cst_17 = arith.constant dense<0.000000e+00> : vector<8xf32>
    %53 = vector.multi_reduction <add>, %52, %cst_17 [1] : vector<8x8xf32> to vector<8xf32>
    %54 = vector.shape_cast %53 : vector<8xf32> to vector<8x1xf32>
    %55 = tpu.reciprocal %54 {approx = true} : vector<8x1xf32> -> vector<8x1xf32>
    %56 = vector.broadcast %55 : vector<8x1xf32> to vector<8x8xf32>
    %57 = arith.mulf %52, %56 : vector<8x8xf32>
    %cst_18 = arith.constant dense<0.000000e+00> : vector<8x16xf32>
    %58 = tpu.matmul %57, %45, %cst_18 {dimension_numbers = #tpu.dot_dimension_numbers<[1], [0], [0], [1], [0, 0, 1, 1], [], []>} : vector<8x8xf32>, vector<8x16xf32>, vector<8x16xf32> -> vector<8x16xf32>
    %59 = vector.extract_strided_slice %40 {offsets = [0, 16], sizes = [8, 16], strides = [1, 1]} : vector<16x32xf32> to vector<8x16xf32>
    %60 = vector.extract_strided_slice %41 {offsets = [0, 16], sizes = [8, 16], strides = [1, 1]} : vector<16x32xf32> to vector<8x16xf32>
    %61 = vector.extract_strided_slice %42 {offsets = [0, 16], sizes = [8, 16], strides = [1, 1]} : vector<16x32xf32> to vector<8x16xf32>
    %cst_19 = arith.constant dense<0.000000e+00> : vector<8x8xf32>
    %62 = tpu.matmul %59, %60, %cst_19 {dimension_numbers = #tpu.dot_dimension_numbers<[1], [1], [0], [0], [0, 0, 1, 0], [], []>} : vector<8x16xf32>, vector<8x16xf32>, vector<8x8xf32> -> vector<8x8xf32>
    %63 = arith.addf %62, %30 : vector<8x8xf32>
    %cst_20 = arith.constant dense<0xFF800000> : vector<8xf32>
    %64 = vector.multi_reduction <maximumf>, %63, %cst_20 [1] : vector<8x8xf32> to vector<8xf32>
    %65 = vector.shape_cast %64 : vector<8xf32> to vector<8x1xf32>
    %66 = vector.broadcast %65 : vector<8x1xf32> to vector<8x8xf32>
    %67 = arith.subf %63, %66 : vector<8x8xf32>
    %68 = math.exp %67 : vector<8x8xf32>
    %cst_21 = arith.constant dense<0.000000e+00> : vector<8xf32>
    %69 = vector.multi_reduction <add>, %68, %cst_21 [1] : vector<8x8xf32> to vector<8xf32>
    %70 = vector.shape_cast %69 : vector<8xf32> to vector<8x1xf32>
    %71 = tpu.reciprocal %70 {approx = true} : vector<8x1xf32> -> vector<8x1xf32>
    %72 = vector.broadcast %71 : vector<8x1xf32> to vector<8x8xf32>
    %73 = arith.mulf %68, %72 : vector<8x8xf32>
    %cst_22 = arith.constant dense<0.000000e+00> : vector<8x16xf32>
    %74 = tpu.matmul %73, %61, %cst_22 {dimension_numbers = #tpu.dot_dimension_numbers<[1], [0], [0], [1], [0, 0, 1, 1], [], []>} : vector<8x8xf32>, vector<8x16xf32>, vector<8x16xf32> -> vector<8x16xf32>
    %75 = tpu.concatenate %58, %74 in 1 : vector<8x16xf32>, vector<8x16xf32> -> vector<8x32xf32>
    %76 = vector.extract_strided_slice %40 {offsets = [8, 0], sizes = [8, 16], strides = [1, 1]} : vector<16x32xf32> to vector<8x16xf32>
    %77 = vector.extract_strided_slice %41 {offsets = [8, 0], sizes = [8, 16], strides = [1, 1]} : vector<16x32xf32> to vector<8x16xf32>
    %78 = vector.extract_strided_slice %42 {offsets = [8, 0], sizes = [8, 16], strides = [1, 1]} : vector<16x32xf32> to vector<8x16xf32>
    %cst_23 = arith.constant dense<0.000000e+00> : vector<8x8xf32>
    %79 = tpu.matmul %76, %77, %cst_23 {dimension_numbers = #tpu.dot_dimension_numbers<[1], [1], [0], [0], [0, 0, 1, 0], [], []>} : vector<8x16xf32>, vector<8x16xf32>, vector<8x8xf32> -> vector<8x8xf32>
    %80 = arith.addf %79, %33 : vector<8x8xf32>
    %cst_24 = arith.constant dense<0xFF800000> : vector<8xf32>
    %81 = vector.multi_reduction <maximumf>, %80, %cst_24 [1] : vector<8x8xf32> to vector<8xf32>
    %82 = vector.shape_cast %81 : vector<8xf32> to vector<8x1xf32>
    %83 = vector.broadcast %82 : vector<8x1xf32> to vector<8x8xf32>
    %84 = arith.subf %80, %83 : vector<8x8xf32>
    %85 = math.exp %84 : vector<8x8xf32>
    %cst_25 = arith.constant dense<0.000000e+00> : vector<8xf32>
    %86 = vector.multi_reduction <add>, %85, %cst_25 [1] : vector<8x8xf32> to vector<8xf32>
    %87 = vector.shape_cast %86 : vector<8xf32> to vector<8x1xf32>
    %88 = tpu.reciprocal %87 {approx = true} : vector<8x1xf32> -> vector<8x1xf32>
    %89 = vector.broadcast %88 : vector<8x1xf32> to vector<8x8xf32>
    %90 = arith.mulf %85, %89 : vector<8x8xf32>
    %cst_26 = arith.constant dense<0.000000e+00> : vector<8x16xf32>
    %91 = tpu.matmul %90, %78, %cst_26 {dimension_numbers = #tpu.dot_dimension_numbers<[1], [0], [0], [1], [0, 0, 1, 1], [], []>} : vector<8x8xf32>, vector<8x16xf32>, vector<8x16xf32> -> vector<8x16xf32>
    %92 = vector.extract_strided_slice %40 {offsets = [8, 16], sizes = [8, 16], strides = [1, 1]} : vector<16x32xf32> to vector<8x16xf32>
    %93 = vector.extract_strided_slice %41 {offsets = [8, 16], sizes = [8, 16], strides = [1, 1]} : vector<16x32xf32> to vector<8x16xf32>
    %94 = vector.extract_strided_slice %42 {offsets = [8, 16], sizes = [8, 16], strides = [1, 1]} : vector<16x32xf32> to vector<8x16xf32>
    %cst_27 = arith.constant dense<0.000000e+00> : vector<8x8xf32>
    %95 = tpu.matmul %92, %93, %cst_27 {dimension_numbers = #tpu.dot_dimension_numbers<[1], [1], [0], [0], [0, 0, 1, 0], [], []>} : vector<8x16xf32>, vector<8x16xf32>, vector<8x8xf32> -> vector<8x8xf32>
    %96 = arith.addf %95, %33 : vector<8x8xf32>
    %cst_28 = arith.constant dense<0xFF800000> : vector<8xf32>
    %97 = vector.multi_reduction <maximumf>, %96, %cst_28 [1] : vector<8x8xf32> to vector<8xf32>
    %98 = vector.shape_cast %97 : vector<8xf32> to vector<8x1xf32>
    %99 = vector.broadcast %98 : vector<8x1xf32> to vector<8x8xf32>
    %100 = arith.subf %96, %99 : vector<8x8xf32>
    %101 = math.exp %100 : vector<8x8xf32>
    %cst_29 = arith.constant dense<0.000000e+00> : vector<8xf32>
    %102 = vector.multi_reduction <add>, %101, %cst_29 [1] : vector<8x8xf32> to vector<8xf32>
    %103 = vector.shape_cast %102 : vector<8xf32> to vector<8x1xf32>
    %104 = tpu.reciprocal %103 {approx = true} : vector<8x1xf32> -> vector<8x1xf32>
    %105 = vector.broadcast %104 : vector<8x1xf32> to vector<8x8xf32>
    %106 = arith.mulf %101, %105 : vector<8x8xf32>
    %cst_30 = arith.constant dense<0.000000e+00> : vector<8x16xf32>
    %107 = tpu.matmul %106, %94, %cst_30 {dimension_numbers = #tpu.dot_dimension_numbers<[1], [0], [0], [1], [0, 0, 1, 1], [], []>} : vector<8x8xf32>, vector<8x16xf32>, vector<8x16xf32> -> vector<8x16xf32>
    %108 = tpu.concatenate %91, %107 in 1 : vector<8x16xf32>, vector<8x16xf32> -> vector<8x32xf32>
    %109 = tpu.concatenate %75, %108 in 0 : vector<8x32xf32>, vector<8x32xf32> -> vector<16x32xf32>
    %c0_31 = arith.constant 0 : index
    %c32 = arith.constant 32 : index
    %c0_32 = arith.constant 0 : index
    %110 = vector.load %arg2[%c0_31, %c32, %c0_32] : memref<2x256x128xf32, #tpu.memory_space<vmem>>, vector<1x32x32xf32>
    %111 = vector.shape_cast %110 : vector<1x32x32xf32> to vector<32x32xf32>
    %cst_33 = arith.constant dense<0.000000e+00> : vector<16x32xf32>
    %112 = tpu.matmul %109, %111, %cst_33 {dimension_numbers = #tpu.dot_dimension_numbers<[1], [0], [0], [1], [0, 0, 1, 1], [], []>} : vector<16x32xf32>, vector<32x32xf32>, vector<16x32xf32> -> vector<16x32xf32>
    %c5 = arith.constant 5 : index
    %c0_34 = arith.constant 0 : index
    %113 = vector.load %arg3[%c5, %c0_34] : memref<32x128xf32, #tpu.memory_space<vmem>>, vector<1x32xf32>
    %114 = vector.broadcast %113 : vector<1x32xf32> to vector<16x32xf32>
    %115 = arith.addf %112, %114 : vector<16x32xf32>
    %c0_35 = arith.constant 0 : index
    %c64 = arith.constant 64 : index
    %c0_36 = arith.constant 0 : index
    %116 = vector.load %arg2[%c0_35, %c64, %c0_36] : memref<2x256x128xf32, #tpu.memory_space<vmem>>, vector<1x32x16xf32>
    %117 = vector.shape_cast %116 : vector<1x32x16xf32> to vector<32x16xf32>
    %c6 = arith.constant 6 : index
    %c0_37 = arith.constant 0 : index
    %118 = vector.load %arg3[%c6, %c0_37] : memref<32x128xf32, #tpu.memory_space<vmem>>, vector<1x16xf32>
    %c0_38 = arith.constant 0 : index
    %c96 = arith.constant 96 : index
    %c0_39 = arith.constant 0 : index
    %119 = vector.load %arg2[%c0_38, %c96, %c0_39] : memref<2x256x128xf32, #tpu.memory_space<vmem>>, vector<1x16x32xf32>
    %120 = vector.shape_cast %119 : vector<1x16x32xf32> to vector<16x32xf32>
    %c7 = arith.constant 7 : index
    %c0_40 = arith.constant 0 : index
    %121 = vector.load %arg3[%c7, %c0_40] : memref<32x128xf32, #tpu.memory_space<vmem>>, vector<1x32xf32>
    %cst_41 = arith.constant dense<0.000000e+00> : vector<16x16xf32>
    %122 = tpu.matmul %115, %117, %cst_41 {dimension_numbers = #tpu.dot_dimension_numbers<[1], [0], [0], [1], [0, 0, 1, 1], [], []>} : vector<16x32xf32>, vector<32x16xf32>, vector<16x16xf32> -> vector<16x16xf32>
    %123 = vector.broadcast %118 : vector<1x16xf32> to vector<16x16xf32>
    %124 = arith.addf %122, %123 : vector<16x16xf32>
    %cst_42 = arith.constant 0.000000e+00 : f32
    %125 = vector.broadcast %cst_42 : f32 to vector<16x16xf32>
    %126 = arith.maximumf %124, %125 : vector<16x16xf32>
    %cst_43 = arith.constant dense<0.000000e+00> : vector<16x32xf32>
    %127 = tpu.matmul %126, %120, %cst_43 {dimension_numbers = #tpu.dot_dimension_numbers<[1], [0], [0], [1], [0, 0, 1, 1], [], []>} : vector<16x16xf32>, vector<16x32xf32>, vector<16x32xf32> -> vector<16x32xf32>
    %128 = arith.addf %115, %127 : vector<16x32xf32>
    %129 = vector.broadcast %121 : vector<1x32xf32> to vector<16x32xf32>
    %130 = arith.addf %128, %129 : vector<16x32xf32>
    %131 = arith.addf %130, %26 : vector<16x32xf32>
    %c8 = arith.constant 8 : index
    %c0_44 = arith.constant 0 : index
    %132 = vector.load %arg3[%c8, %c0_44] : memref<32x128xf32, #tpu.memory_space<vmem>>, vector<1x32xf32>
    %c9 = arith.constant 9 : index
    %c0_45 = arith.constant 0 : index
    %133 = vector.load %arg3[%c9, %c0_45] : memref<32x128xf32, #tpu.memory_space<vmem>>, vector<1x32xf32>
    %cst_46 = arith.constant dense<0.000000e+00> : vector<16xf32>
    %134 = vector.multi_reduction <add>, %131, %cst_46 [1] : vector<16x32xf32> to vector<16xf32>
    %135 = vector.shape_cast %134 : vector<16xf32> to vector<16x1xf32>
    %cst_47 = arith.constant 3.200000e+01 : f32
    %136 = vector.broadcast %cst_47 : f32 to vector<16x1xf32>
    %137 = arith.divf %135, %136 : vector<16x1xf32>
    %138 = vector.broadcast %137 : vector<16x1xf32> to vector<16x32xf32>
    %139 = arith.subf %131, %138 : vector<16x32xf32>
    %140 = vector.broadcast %137 : vector<16x1xf32> to vector<16x32xf32>
    %141 = arith.subf %131, %140 : vector<16x32xf32>
    %142 = arith.mulf %139, %141 : vector<16x32xf32>
    %cst_48 = arith.constant dense<0.000000e+00> : vector<16xf32>
    %143 = vector.multi_reduction <add>, %142, %cst_48 [1] : vector<16x32xf32> to vector<16xf32>
    %144 = vector.shape_cast %143 : vector<16xf32> to vector<16x1xf32>
    %cst_49 = arith.constant 3.200000e+01 : f32
    %145 = vector.broadcast %cst_49 : f32 to vector<16x1xf32>
    %146 = arith.divf %144, %145 : vector<16x1xf32>
    %147 = vector.broadcast %137 : vector<16x1xf32> to vector<16x32xf32>
    %148 = arith.subf %131, %147 : vector<16x32xf32>
    %cst_50 = arith.constant 9.99999996E-13 : f32
    %149 = vector.broadcast %cst_50 : f32 to vector<16x1xf32>
    %150 = arith.addf %146, %149 : vector<16x1xf32>
    %151 = math.rsqrt %150 : vector<16x1xf32>
    %152 = vector.broadcast %151 : vector<16x1xf32> to vector<16x32xf32>
    %153 = arith.mulf %148, %152 : vector<16x32xf32>
    %154 = vector.broadcast %132 : vector<1x32xf32> to vector<16x32xf32>
    %155 = arith.mulf %153, %154 : vector<16x32xf32>
    %156 = vector.broadcast %133 : vector<1x32xf32> to vector<16x32xf32>
    %157 = arith.addf %155, %156 : vector<16x32xf32>
    %c0_51 = arith.constant 0 : index
    %c112 = arith.constant 112 : index
    %c0_52 = arith.constant 0 : index
    %158 = vector.load %arg2[%c0_51, %c112, %c0_52] : memref<2x256x128xf32, #tpu.memory_space<vmem>>, vector<1x32x64xf32>
    %159 = vector.shape_cast %158 : vector<1x32x64xf32> to vector<32x64xf32>
    %cst_53 = arith.constant dense<0.000000e+00> : vector<16x64xf32>
    %160 = tpu.matmul %157, %159, %cst_53 {dimension_numbers = #tpu.dot_dimension_numbers<[1], [0], [0], [1], [0, 0, 1, 1], [], []>} : vector<16x32xf32>, vector<32x64xf32>, vector<16x64xf32> -> vector<16x64xf32>
    %c10 = arith.constant 10 : index
    %c0_54 = arith.constant 0 : index
    %161 = vector.load %arg3[%c10, %c0_54] : memref<32x128xf32, #tpu.memory_space<vmem>>, vector<1x64xf32>
    %162 = vector.broadcast %161 : vector<1x64xf32> to vector<16x64xf32>
    %163 = arith.addf %160, %162 : vector<16x64xf32>
    %cst_55 = arith.constant 5.000000e-01 : f32
    %164 = vector.broadcast %cst_55 : f32 to vector<16x64xf32>
    %165 = arith.mulf %164, %163 : vector<16x64xf32>
    %cst_56 = arith.constant 4.471500e-02 : f32
    %166 = vector.broadcast %cst_56 : f32 to vector<16x64xf32>
    %167 = arith.mulf %166, %163 : vector<16x64xf32>
    %168 = arith.mulf %167, %163 : vector<16x64xf32>
    %169 = arith.mulf %168, %163 : vector<16x64xf32>
    %170 = arith.addf %163, %169 : vector<16x64xf32>
    %cst_57 = arith.constant 0.797884583 : f32
    %171 = vector.broadcast %cst_57 : f32 to vector<16x64xf32>
    %172 = arith.mulf %171, %170 : vector<16x64xf32>
    %173 = math.tanh %172 : vector<16x64xf32>
    %cst_58 = arith.constant 1.000000e+00 : f32
    %174 = vector.broadcast %cst_58 : f32 to vector<16x64xf32>
    %175 = arith.addf %174, %173 : vector<16x64xf32>
    %176 = arith.mulf %165, %175 : vector<16x64xf32>
    %c0_59 = arith.constant 0 : index
    %c144 = arith.constant 144 : index
    %c0_60 = arith.constant 0 : index
    %177 = vector.load %arg2[%c0_59, %c144, %c0_60] : memref<2x256x128xf32, #tpu.memory_space<vmem>>, vector<1x64x32xf32>
    %178 = vector.shape_cast %177 : vector<1x64x32xf32> to vector<64x32xf32>
    %cst_61 = arith.constant dense<0.000000e+00> : vector<16x32xf32>
    %179 = tpu.matmul %176, %178, %cst_61 {dimension_numbers = #tpu.dot_dimension_numbers<[1], [0], [0], [1], [0, 0, 1, 1], [], []>} : vector<16x64xf32>, vector<64x32xf32>, vector<16x32xf32> -> vector<16x32xf32>
    %c11 = arith.constant 11 : index
    %c0_62 = arith.constant 0 : index
    %180 = vector.load %arg3[%c11, %c0_62] : memref<32x128xf32, #tpu.memory_space<vmem>>, vector<1x32xf32>
    %181 = vector.broadcast %180 : vector<1x32xf32> to vector<16x32xf32>
    %182 = arith.addf %179, %181 : vector<16x32xf32>
    %c0_63 = arith.constant 0 : index
    %c208 = arith.constant 208 : index
    %c0_64 = arith.constant 0 : index
    %183 = vector.load %arg2[%c0_63, %c208, %c0_64] : memref<2x256x128xf32, #tpu.memory_space<vmem>>, vector<1x32x16xf32>
    %184 = vector.shape_cast %183 : vector<1x32x16xf32> to vector<32x16xf32>
    %c12 = arith.constant 12 : index
    %c0_65 = arith.constant 0 : index
    %185 = vector.load %arg3[%c12, %c0_65] : memref<32x128xf32, #tpu.memory_space<vmem>>, vector<1x16xf32>
    %c0_66 = arith.constant 0 : index
    %c240 = arith.constant 240 : index
    %c0_67 = arith.constant 0 : index
    %186 = vector.load %arg2[%c0_66, %c240, %c0_67] : memref<2x256x128xf32, #tpu.memory_space<vmem>>, vector<1x16x32xf32>
    %187 = vector.shape_cast %186 : vector<1x16x32xf32> to vector<16x32xf32>
    %c13 = arith.constant 13 : index
    %c0_68 = arith.constant 0 : index
    %188 = vector.load %arg3[%c13, %c0_68] : memref<32x128xf32, #tpu.memory_space<vmem>>, vector<1x32xf32>
    %cst_69 = arith.constant dense<0.000000e+00> : vector<16x16xf32>
    %189 = tpu.matmul %182, %184, %cst_69 {dimension_numbers = #tpu.dot_dimension_numbers<[1], [0], [0], [1], [0, 0, 1, 1], [], []>} : vector<16x32xf32>, vector<32x16xf32>, vector<16x16xf32> -> vector<16x16xf32>
    %190 = vector.broadcast %185 : vector<1x16xf32> to vector<16x16xf32>
    %191 = arith.addf %189, %190 : vector<16x16xf32>
    %cst_70 = arith.constant 0.000000e+00 : f32
    %192 = vector.broadcast %cst_70 : f32 to vector<16x16xf32>
    %193 = arith.maximumf %191, %192 : vector<16x16xf32>
    %cst_71 = arith.constant dense<0.000000e+00> : vector<16x32xf32>
    %194 = tpu.matmul %193, %187, %cst_71 {dimension_numbers = #tpu.dot_dimension_numbers<[1], [0], [0], [1], [0, 0, 1, 1], [], []>} : vector<16x16xf32>, vector<16x32xf32>, vector<16x32xf32> -> vector<16x32xf32>
    %195 = arith.addf %182, %194 : vector<16x32xf32>
    %196 = vector.broadcast %188 : vector<1x32xf32> to vector<16x32xf32>
    %197 = arith.addf %195, %196 : vector<16x32xf32>
    %198 = arith.addf %197, %157 : vector<16x32xf32>
    %c14 = arith.constant 14 : index
    %c0_72 = arith.constant 0 : index
    %199 = vector.load %arg3[%c14, %c0_72] : memref<32x128xf32, #tpu.memory_space<vmem>>, vector<1x32xf32>
    %c15 = arith.constant 15 : index
    %c0_73 = arith.constant 0 : index
    %200 = vector.load %arg3[%c15, %c0_73] : memref<32x128xf32, #tpu.memory_space<vmem>>, vector<1x32xf32>
    %cst_74 = arith.constant dense<0.000000e+00> : vector<16xf32>
    %201 = vector.multi_reduction <add>, %198, %cst_74 [1] : vector<16x32xf32> to vector<16xf32>
    %202 = vector.shape_cast %201 : vector<16xf32> to vector<16x1xf32>
    %cst_75 = arith.constant 3.200000e+01 : f32
    %203 = vector.broadcast %cst_75 : f32 to vector<16x1xf32>
    %204 = arith.divf %202, %203 : vector<16x1xf32>
    %205 = vector.broadcast %204 : vector<16x1xf32> to vector<16x32xf32>
    %206 = arith.subf %198, %205 : vector<16x32xf32>
    %207 = vector.broadcast %204 : vector<16x1xf32> to vector<16x32xf32>
    %208 = arith.subf %198, %207 : vector<16x32xf32>
    %209 = arith.mulf %206, %208 : vector<16x32xf32>
    %cst_76 = arith.constant dense<0.000000e+00> : vector<16xf32>
    %210 = vector.multi_reduction <add>, %209, %cst_76 [1] : vector<16x32xf32> to vector<16xf32>
    %211 = vector.shape_cast %210 : vector<16xf32> to vector<16x1xf32>
    %cst_77 = arith.constant 3.200000e+01 : f32
    %212 = vector.broadcast %cst_77 : f32 to vector<16x1xf32>
    %213 = arith.divf %211, %212 : vector<16x1xf32>
    %214 = vector.broadcast %204 : vector<16x1xf32> to vector<16x32xf32>
    %215 = arith.subf %198, %214 : vector<16x32xf32>
    %cst_78 = arith.constant 9.99999996E-13 : f32
    %216 = vector.broadcast %cst_78 : f32 to vector<16x1xf32>
    %217 = arith.addf %213, %216 : vector<16x1xf32>
    %218 = math.rsqrt %217 : vector<16x1xf32>
    %219 = vector.broadcast %218 : vector<16x1xf32> to vector<16x32xf32>
    %220 = arith.mulf %215, %219 : vector<16x32xf32>
    %221 = vector.broadcast %199 : vector<1x32xf32> to vector<16x32xf32>
    %222 = arith.mulf %220, %221 : vector<16x32xf32>
    %223 = vector.broadcast %200 : vector<1x32xf32> to vector<16x32xf32>
    %224 = arith.addf %222, %223 : vector<16x32xf32>
    %c1_79 = arith.constant 1 : index
    %c0_80 = arith.constant 0 : index
    %c0_81 = arith.constant 0 : index
    %225 = vector.load %arg2[%c1_79, %c0_80, %c0_81] : memref<2x256x128xf32, #tpu.memory_space<vmem>>, vector<1x32x96xf32>
    %226 = vector.shape_cast %225 : vector<1x32x96xf32> to vector<32x96xf32>
    %cst_82 = arith.constant dense<0.000000e+00> : vector<16x96xf32>
    %227 = tpu.matmul %224, %226, %cst_82 {dimension_numbers = #tpu.dot_dimension_numbers<[1], [0], [0], [1], [0, 0, 1, 1], [], []>} : vector<16x32xf32>, vector<32x96xf32>, vector<16x96xf32> -> vector<16x96xf32>
    %c16 = arith.constant 16 : index
    %c0_83 = arith.constant 0 : index
    %228 = vector.load %arg3[%c16, %c0_83] : memref<32x128xf32, #tpu.memory_space<vmem>>, vector<1x96xf32>
    %229 = vector.broadcast %228 : vector<1x96xf32> to vector<16x96xf32>
    %230 = arith.addf %227, %229 : vector<16x96xf32>
    %231 = vector.extract_strided_slice %230 {offsets = [0, 0], sizes = [16, 32], strides = [1, 1]} : vector<16x96xf32> to vector<16x32xf32>
    %232 = vector.extract_strided_slice %230 {offsets = [0, 32], sizes = [16, 32], strides = [1, 1]} : vector<16x96xf32> to vector<16x32xf32>
    %233 = vector.extract_strided_slice %230 {offsets = [0, 64], sizes = [16, 32], strides = [1, 1]} : vector<16x96xf32> to vector<16x32xf32>
    %234 = vector.extract_strided_slice %231 {offsets = [0, 0], sizes = [8, 16], strides = [1, 1]} : vector<16x32xf32> to vector<8x16xf32>
    %235 = vector.extract_strided_slice %232 {offsets = [0, 0], sizes = [8, 16], strides = [1, 1]} : vector<16x32xf32> to vector<8x16xf32>
    %236 = vector.extract_strided_slice %233 {offsets = [0, 0], sizes = [8, 16], strides = [1, 1]} : vector<16x32xf32> to vector<8x16xf32>
    %cst_84 = arith.constant dense<0.000000e+00> : vector<8x8xf32>
    %237 = tpu.matmul %234, %235, %cst_84 {dimension_numbers = #tpu.dot_dimension_numbers<[1], [1], [0], [0], [0, 0, 1, 0], [], []>} : vector<8x16xf32>, vector<8x16xf32>, vector<8x8xf32> -> vector<8x8xf32>
    %238 = arith.addf %237, %30 : vector<8x8xf32>
    %cst_85 = arith.constant dense<0xFF800000> : vector<8xf32>
    %239 = vector.multi_reduction <maximumf>, %238, %cst_85 [1] : vector<8x8xf32> to vector<8xf32>
    %240 = vector.shape_cast %239 : vector<8xf32> to vector<8x1xf32>
    %241 = vector.broadcast %240 : vector<8x1xf32> to vector<8x8xf32>
    %242 = arith.subf %238, %241 : vector<8x8xf32>
    %243 = math.exp %242 : vector<8x8xf32>
    %cst_86 = arith.constant dense<0.000000e+00> : vector<8xf32>
    %244 = vector.multi_reduction <add>, %243, %cst_86 [1] : vector<8x8xf32> to vector<8xf32>
    %245 = vector.shape_cast %244 : vector<8xf32> to vector<8x1xf32>
    %246 = tpu.reciprocal %245 {approx = true} : vector<8x1xf32> -> vector<8x1xf32>
    %247 = vector.broadcast %246 : vector<8x1xf32> to vector<8x8xf32>
    %248 = arith.mulf %243, %247 : vector<8x8xf32>
    %cst_87 = arith.constant dense<0.000000e+00> : vector<8x16xf32>
    %249 = tpu.matmul %248, %236, %cst_87 {dimension_numbers = #tpu.dot_dimension_numbers<[1], [0], [0], [1], [0, 0, 1, 1], [], []>} : vector<8x8xf32>, vector<8x16xf32>, vector<8x16xf32> -> vector<8x16xf32>
    %250 = vector.extract_strided_slice %231 {offsets = [0, 16], sizes = [8, 16], strides = [1, 1]} : vector<16x32xf32> to vector<8x16xf32>
    %251 = vector.extract_strided_slice %232 {offsets = [0, 16], sizes = [8, 16], strides = [1, 1]} : vector<16x32xf32> to vector<8x16xf32>
    %252 = vector.extract_strided_slice %233 {offsets = [0, 16], sizes = [8, 16], strides = [1, 1]} : vector<16x32xf32> to vector<8x16xf32>
    %cst_88 = arith.constant dense<0.000000e+00> : vector<8x8xf32>
    %253 = tpu.matmul %250, %251, %cst_88 {dimension_numbers = #tpu.dot_dimension_numbers<[1], [1], [0], [0], [0, 0, 1, 0], [], []>} : vector<8x16xf32>, vector<8x16xf32>, vector<8x8xf32> -> vector<8x8xf32>
    %254 = arith.addf %253, %30 : vector<8x8xf32>
    %cst_89 = arith.constant dense<0xFF800000> : vector<8xf32>
    %255 = vector.multi_reduction <maximumf>, %254, %cst_89 [1] : vector<8x8xf32> to vector<8xf32>
    %256 = vector.shape_cast %255 : vector<8xf32> to vector<8x1xf32>
    %257 = vector.broadcast %256 : vector<8x1xf32> to vector<8x8xf32>
    %258 = arith.subf %254, %257 : vector<8x8xf32>
    %259 = math.exp %258 : vector<8x8xf32>
    %cst_90 = arith.constant dense<0.000000e+00> : vector<8xf32>
    %260 = vector.multi_reduction <add>, %259, %cst_90 [1] : vector<8x8xf32> to vector<8xf32>
    %261 = vector.shape_cast %260 : vector<8xf32> to vector<8x1xf32>
    %262 = tpu.reciprocal %261 {approx = true} : vector<8x1xf32> -> vector<8x1xf32>
    %263 = vector.broadcast %262 : vector<8x1xf32> to vector<8x8xf32>
    %264 = arith.mulf %259, %263 : vector<8x8xf32>
    %cst_91 = arith.constant dense<0.000000e+00> : vector<8x16xf32>
    %265 = tpu.matmul %264, %252, %cst_91 {dimension_numbers = #tpu.dot_dimension_numbers<[1], [0], [0], [1], [0, 0, 1, 1], [], []>} : vector<8x8xf32>, vector<8x16xf32>, vector<8x16xf32> -> vector<8x16xf32>
    %266 = tpu.concatenate %249, %265 in 1 : vector<8x16xf32>, vector<8x16xf32> -> vector<8x32xf32>
    %267 = vector.extract_strided_slice %231 {offsets = [8, 0], sizes = [8, 16], strides = [1, 1]} : vector<16x32xf32> to vector<8x16xf32>
    %268 = vector.extract_strided_slice %232 {offsets = [8, 0], sizes = [8, 16], strides = [1, 1]} : vector<16x32xf32> to vector<8x16xf32>
    %269 = vector.extract_strided_slice %233 {offsets = [8, 0], sizes = [8, 16], strides = [1, 1]} : vector<16x32xf32> to vector<8x16xf32>
    %cst_92 = arith.constant dense<0.000000e+00> : vector<8x8xf32>
    %270 = tpu.matmul %267, %268, %cst_92 {dimension_numbers = #tpu.dot_dimension_numbers<[1], [1], [0], [0], [0, 0, 1, 0], [], []>} : vector<8x16xf32>, vector<8x16xf32>, vector<8x8xf32> -> vector<8x8xf32>
    %271 = arith.addf %270, %33 : vector<8x8xf32>
    %cst_93 = arith.constant dense<0xFF800000> : vector<8xf32>
    %272 = vector.multi_reduction <maximumf>, %271, %cst_93 [1] : vector<8x8xf32> to vector<8xf32>
    %273 = vector.shape_cast %272 : vector<8xf32> to vector<8x1xf32>
    %274 = vector.broadcast %273 : vector<8x1xf32> to vector<8x8xf32>
    %275 = arith.subf %271, %274 : vector<8x8xf32>
    %276 = math.exp %275 : vector<8x8xf32>
    %cst_94 = arith.constant dense<0.000000e+00> : vector<8xf32>
    %277 = vector.multi_reduction <add>, %276, %cst_94 [1] : vector<8x8xf32> to vector<8xf32>
    %278 = vector.shape_cast %277 : vector<8xf32> to vector<8x1xf32>
    %279 = tpu.reciprocal %278 {approx = true} : vector<8x1xf32> -> vector<8x1xf32>
    %280 = vector.broadcast %279 : vector<8x1xf32> to vector<8x8xf32>
    %281 = arith.mulf %276, %280 : vector<8x8xf32>
    %cst_95 = arith.constant dense<0.000000e+00> : vector<8x16xf32>
    %282 = tpu.matmul %281, %269, %cst_95 {dimension_numbers = #tpu.dot_dimension_numbers<[1], [0], [0], [1], [0, 0, 1, 1], [], []>} : vector<8x8xf32>, vector<8x16xf32>, vector<8x16xf32> -> vector<8x16xf32>
    %283 = vector.extract_strided_slice %231 {offsets = [8, 16], sizes = [8, 16], strides = [1, 1]} : vector<16x32xf32> to vector<8x16xf32>
    %284 = vector.extract_strided_slice %232 {offsets = [8, 16], sizes = [8, 16], strides = [1, 1]} : vector<16x32xf32> to vector<8x16xf32>
    %285 = vector.extract_strided_slice %233 {offsets = [8, 16], sizes = [8, 16], strides = [1, 1]} : vector<16x32xf32> to vector<8x16xf32>
    %cst_96 = arith.constant dense<0.000000e+00> : vector<8x8xf32>
    %286 = tpu.matmul %283, %284, %cst_96 {dimension_numbers = #tpu.dot_dimension_numbers<[1], [1], [0], [0], [0, 0, 1, 0], [], []>} : vector<8x16xf32>, vector<8x16xf32>, vector<8x8xf32> -> vector<8x8xf32>
    %287 = arith.addf %286, %33 : vector<8x8xf32>
    %cst_97 = arith.constant dense<0xFF800000> : vector<8xf32>
    %288 = vector.multi_reduction <maximumf>, %287, %cst_97 [1] : vector<8x8xf32> to vector<8xf32>
    %289 = vector.shape_cast %288 : vector<8xf32> to vector<8x1xf32>
    %290 = vector.broadcast %289 : vector<8x1xf32> to vector<8x8xf32>
    %291 = arith.subf %287, %290 : vector<8x8xf32>
    %292 = math.exp %291 : vector<8x8xf32>
    %cst_98 = arith.constant dense<0.000000e+00> : vector<8xf32>
    %293 = vector.multi_reduction <add>, %292, %cst_98 [1] : vector<8x8xf32> to vector<8xf32>
    %294 = vector.shape_cast %293 : vector<8xf32> to vector<8x1xf32>
    %295 = tpu.reciprocal %294 {approx = true} : vector<8x1xf32> -> vector<8x1xf32>
    %296 = vector.broadcast %295 : vector<8x1xf32> to vector<8x8xf32>
    %297 = arith.mulf %292, %296 : vector<8x8xf32>
    %cst_99 = arith.constant dense<0.000000e+00> : vector<8x16xf32>
    %298 = tpu.matmul %297, %285, %cst_99 {dimension_numbers = #tpu.dot_dimension_numbers<[1], [0], [0], [1], [0, 0, 1, 1], [], []>} : vector<8x8xf32>, vector<8x16xf32>, vector<8x16xf32> -> vector<8x16xf32>
    %299 = tpu.concatenate %282, %298 in 1 : vector<8x16xf32>, vector<8x16xf32> -> vector<8x32xf32>
    %300 = tpu.concatenate %266, %299 in 0 : vector<8x32xf32>, vector<8x32xf32> -> vector<16x32xf32>
    %c1_100 = arith.constant 1 : index
    %c32_101 = arith.constant 32 : index
    %c0_102 = arith.constant 0 : index
    %301 = vector.load %arg2[%c1_100, %c32_101, %c0_102] : memref<2x256x128xf32, #tpu.memory_space<vmem>>, vector<1x32x32xf32>
    %302 = vector.shape_cast %301 : vector<1x32x32xf32> to vector<32x32xf32>
    %cst_103 = arith.constant dense<0.000000e+00> : vector<16x32xf32>
    %303 = tpu.matmul %300, %302, %cst_103 {dimension_numbers = #tpu.dot_dimension_numbers<[1], [0], [0], [1], [0, 0, 1, 1], [], []>} : vector<16x32xf32>, vector<32x32xf32>, vector<16x32xf32> -> vector<16x32xf32>
    %c17 = arith.constant 17 : index
    %c0_104 = arith.constant 0 : index
    %304 = vector.load %arg3[%c17, %c0_104] : memref<32x128xf32, #tpu.memory_space<vmem>>, vector<1x32xf32>
    %305 = vector.broadcast %304 : vector<1x32xf32> to vector<16x32xf32>
    %306 = arith.addf %303, %305 : vector<16x32xf32>
    %c1_105 = arith.constant 1 : index
    %c64_106 = arith.constant 64 : index
    %c0_107 = arith.constant 0 : index
    %307 = vector.load %arg2[%c1_105, %c64_106, %c0_107] : memref<2x256x128xf32, #tpu.memory_space<vmem>>, vector<1x32x16xf32>
    %308 = vector.shape_cast %307 : vector<1x32x16xf32> to vector<32x16xf32>
    %c18 = arith.constant 18 : index
    %c0_108 = arith.constant 0 : index
    %309 = vector.load %arg3[%c18, %c0_108] : memref<32x128xf32, #tpu.memory_space<vmem>>, vector<1x16xf32>
    %c1_109 = arith.constant 1 : index
    %c96_110 = arith.constant 96 : index
    %c0_111 = arith.constant 0 : index
    %310 = vector.load %arg2[%c1_109, %c96_110, %c0_111] : memref<2x256x128xf32, #tpu.memory_space<vmem>>, vector<1x16x32xf32>
    %311 = vector.shape_cast %310 : vector<1x16x32xf32> to vector<16x32xf32>
    %c19 = arith.constant 19 : index
    %c0_112 = arith.constant 0 : index
    %312 = vector.load %arg3[%c19, %c0_112] : memref<32x128xf32, #tpu.memory_space<vmem>>, vector<1x32xf32>
    %cst_113 = arith.constant dense<0.000000e+00> : vector<16x16xf32>
    %313 = tpu.matmul %306, %308, %cst_113 {dimension_numbers = #tpu.dot_dimension_numbers<[1], [0], [0], [1], [0, 0, 1, 1], [], []>} : vector<16x32xf32>, vector<32x16xf32>, vector<16x16xf32> -> vector<16x16xf32>
    %314 = vector.broadcast %309 : vector<1x16xf32> to vector<16x16xf32>
    %315 = arith.addf %313, %314 : vector<16x16xf32>
    %cst_114 = arith.constant 0.000000e+00 : f32
    %316 = vector.broadcast %cst_114 : f32 to vector<16x16xf32>
    %317 = arith.maximumf %315, %316 : vector<16x16xf32>
    %cst_115 = arith.constant dense<0.000000e+00> : vector<16x32xf32>
    %318 = tpu.matmul %317, %311, %cst_115 {dimension_numbers = #tpu.dot_dimension_numbers<[1], [0], [0], [1], [0, 0, 1, 1], [], []>} : vector<16x16xf32>, vector<16x32xf32>, vector<16x32xf32> -> vector<16x32xf32>
    %319 = arith.addf %306, %318 : vector<16x32xf32>
    %320 = vector.broadcast %312 : vector<1x32xf32> to vector<16x32xf32>
    %321 = arith.addf %319, %320 : vector<16x32xf32>
    %322 = arith.addf %321, %224 : vector<16x32xf32>
    %c20 = arith.constant 20 : index
    %c0_116 = arith.constant 0 : index
    %323 = vector.load %arg3[%c20, %c0_116] : memref<32x128xf32, #tpu.memory_space<vmem>>, vector<1x32xf32>
    %c21 = arith.constant 21 : index
    %c0_117 = arith.constant 0 : index
    %324 = vector.load %arg3[%c21, %c0_117] : memref<32x128xf32, #tpu.memory_space<vmem>>, vector<1x32xf32>
    %cst_118 = arith.constant dense<0.000000e+00> : vector<16xf32>
    %325 = vector.multi_reduction <add>, %322, %cst_118 [1] : vector<16x32xf32> to vector<16xf32>
    %326 = vector.shape_cast %325 : vector<16xf32> to vector<16x1xf32>
    %cst_119 = arith.constant 3.200000e+01 : f32
    %327 = vector.broadcast %cst_119 : f32 to vector<16x1xf32>
    %328 = arith.divf %326, %327 : vector<16x1xf32>
    %329 = vector.broadcast %328 : vector<16x1xf32> to vector<16x32xf32>
    %330 = arith.subf %322, %329 : vector<16x32xf32>
    %331 = vector.broadcast %328 : vector<16x1xf32> to vector<16x32xf32>
    %332 = arith.subf %322, %331 : vector<16x32xf32>
    %333 = arith.mulf %330, %332 : vector<16x32xf32>
    %cst_120 = arith.constant dense<0.000000e+00> : vector<16xf32>
    %334 = vector.multi_reduction <add>, %333, %cst_120 [1] : vector<16x32xf32> to vector<16xf32>
    %335 = vector.shape_cast %334 : vector<16xf32> to vector<16x1xf32>
    %cst_121 = arith.constant 3.200000e+01 : f32
    %336 = vector.broadcast %cst_121 : f32 to vector<16x1xf32>
    %337 = arith.divf %335, %336 : vector<16x1xf32>
    %338 = vector.broadcast %328 : vector<16x1xf32> to vector<16x32xf32>
    %339 = arith.subf %322, %338 : vector<16x32xf32>
    %cst_122 = arith.constant 9.99999996E-13 : f32
    %340 = vector.broadcast %cst_122 : f32 to vector<16x1xf32>
    %341 = arith.addf %337, %340 : vector<16x1xf32>
    %342 = math.rsqrt %341 : vector<16x1xf32>
    %343 = vector.broadcast %342 : vector<16x1xf32> to vector<16x32xf32>
    %344 = arith.mulf %339, %343 : vector<16x32xf32>
    %345 = vector.broadcast %323 : vector<1x32xf32> to vector<16x32xf32>
    %346 = arith.mulf %344, %345 : vector<16x32xf32>
    %347 = vector.broadcast %324 : vector<1x32xf32> to vector<16x32xf32>
    %348 = arith.addf %346, %347 : vector<16x32xf32>
    %c1_123 = arith.constant 1 : index
    %c112_124 = arith.constant 112 : index
    %c0_125 = arith.constant 0 : index
    %349 = vector.load %arg2[%c1_123, %c112_124, %c0_125] : memref<2x256x128xf32, #tpu.memory_space<vmem>>, vector<1x32x64xf32>
    %350 = vector.shape_cast %349 : vector<1x32x64xf32> to vector<32x64xf32>
    %cst_126 = arith.constant dense<0.000000e+00> : vector<16x64xf32>
    %351 = tpu.matmul %348, %350, %cst_126 {dimension_numbers = #tpu.dot_dimension_numbers<[1], [0], [0], [1], [0, 0, 1, 1], [], []>} : vector<16x32xf32>, vector<32x64xf32>, vector<16x64xf32> -> vector<16x64xf32>
    %c22 = arith.constant 22 : index
    %c0_127 = arith.constant 0 : index
    %352 = vector.load %arg3[%c22, %c0_127] : memref<32x128xf32, #tpu.memory_space<vmem>>, vector<1x64xf32>
    %353 = vector.broadcast %352 : vector<1x64xf32> to vector<16x64xf32>
    %354 = arith.addf %351, %353 : vector<16x64xf32>
    %cst_128 = arith.constant 5.000000e-01 : f32
    %355 = vector.broadcast %cst_128 : f32 to vector<16x64xf32>
    %356 = arith.mulf %355, %354 : vector<16x64xf32>
    %cst_129 = arith.constant 4.471500e-02 : f32
    %357 = vector.broadcast %cst_129 : f32 to vector<16x64xf32>
    %358 = arith.mulf %357, %354 : vector<16x64xf32>
    %359 = arith.mulf %358, %354 : vector<16x64xf32>
    %360 = arith.mulf %359, %354 : vector<16x64xf32>
    %361 = arith.addf %354, %360 : vector<16x64xf32>
    %cst_130 = arith.constant 0.797884583 : f32
    %362 = vector.broadcast %cst_130 : f32 to vector<16x64xf32>
    %363 = arith.mulf %362, %361 : vector<16x64xf32>
    %364 = math.tanh %363 : vector<16x64xf32>
    %cst_131 = arith.constant 1.000000e+00 : f32
    %365 = vector.broadcast %cst_131 : f32 to vector<16x64xf32>
    %366 = arith.addf %365, %364 : vector<16x64xf32>
    %367 = arith.mulf %356, %366 : vector<16x64xf32>
    %c1_132 = arith.constant 1 : index
    %c144_133 = arith.constant 144 : index
    %c0_134 = arith.constant 0 : index
    %368 = vector.load %arg2[%c1_132, %c144_133, %c0_134] : memref<2x256x128xf32, #tpu.memory_space<vmem>>, vector<1x64x32xf32>
    %369 = vector.shape_cast %368 : vector<1x64x32xf32> to vector<64x32xf32>
    %cst_135 = arith.constant dense<0.000000e+00> : vector<16x32xf32>
    %370 = tpu.matmul %367, %369, %cst_135 {dimension_numbers = #tpu.dot_dimension_numbers<[1], [0], [0], [1], [0, 0, 1, 1], [], []>} : vector<16x64xf32>, vector<64x32xf32>, vector<16x32xf32> -> vector<16x32xf32>
    %c23 = arith.constant 23 : index
    %c0_136 = arith.constant 0 : index
    %371 = vector.load %arg3[%c23, %c0_136] : memref<32x128xf32, #tpu.memory_space<vmem>>, vector<1x32xf32>
    %372 = vector.broadcast %371 : vector<1x32xf32> to vector<16x32xf32>
    %373 = arith.addf %370, %372 : vector<16x32xf32>
    %c1_137 = arith.constant 1 : index
    %c208_138 = arith.constant 208 : index
    %c0_139 = arith.constant 0 : index
    %374 = vector.load %arg2[%c1_137, %c208_138, %c0_139] : memref<2x256x128xf32, #tpu.memory_space<vmem>>, vector<1x32x16xf32>
    %375 = vector.shape_cast %374 : vector<1x32x16xf32> to vector<32x16xf32>
    %c24 = arith.constant 24 : index
    %c0_140 = arith.constant 0 : index
    %376 = vector.load %arg3[%c24, %c0_140] : memref<32x128xf32, #tpu.memory_space<vmem>>, vector<1x16xf32>
    %c1_141 = arith.constant 1 : index
    %c240_142 = arith.constant 240 : index
    %c0_143 = arith.constant 0 : index
    %377 = vector.load %arg2[%c1_141, %c240_142, %c0_143] : memref<2x256x128xf32, #tpu.memory_space<vmem>>, vector<1x16x32xf32>
    %378 = vector.shape_cast %377 : vector<1x16x32xf32> to vector<16x32xf32>
    %c25 = arith.constant 25 : index
    %c0_144 = arith.constant 0 : index
    %379 = vector.load %arg3[%c25, %c0_144] : memref<32x128xf32, #tpu.memory_space<vmem>>, vector<1x32xf32>
    %cst_145 = arith.constant dense<0.000000e+00> : vector<16x16xf32>
    %380 = tpu.matmul %373, %375, %cst_145 {dimension_numbers = #tpu.dot_dimension_numbers<[1], [0], [0], [1], [0, 0, 1, 1], [], []>} : vector<16x32xf32>, vector<32x16xf32>, vector<16x16xf32> -> vector<16x16xf32>
    %381 = vector.broadcast %376 : vector<1x16xf32> to vector<16x16xf32>
    %382 = arith.addf %380, %381 : vector<16x16xf32>
    %cst_146 = arith.constant 0.000000e+00 : f32
    %383 = vector.broadcast %cst_146 : f32 to vector<16x16xf32>
    %384 = arith.maximumf %382, %383 : vector<16x16xf32>
    %cst_147 = arith.constant dense<0.000000e+00> : vector<16x32xf32>
    %385 = tpu.matmul %384, %378, %cst_147 {dimension_numbers = #tpu.dot_dimension_numbers<[1], [0], [0], [1], [0, 0, 1, 1], [], []>} : vector<16x16xf32>, vector<16x32xf32>, vector<16x32xf32> -> vector<16x32xf32>
    %386 = arith.addf %373, %385 : vector<16x32xf32>
    %387 = vector.broadcast %379 : vector<1x32xf32> to vector<16x32xf32>
    %388 = arith.addf %386, %387 : vector<16x32xf32>
    %389 = arith.addf %388, %348 : vector<16x32xf32>
    %c26 = arith.constant 26 : index
    %c0_148 = arith.constant 0 : index
    %390 = vector.load %arg3[%c26, %c0_148] : memref<32x128xf32, #tpu.memory_space<vmem>>, vector<1x32xf32>
    %c27 = arith.constant 27 : index
    %c0_149 = arith.constant 0 : index
    %391 = vector.load %arg3[%c27, %c0_149] : memref<32x128xf32, #tpu.memory_space<vmem>>, vector<1x32xf32>
    %cst_150 = arith.constant dense<0.000000e+00> : vector<16xf32>
    %392 = vector.multi_reduction <add>, %389, %cst_150 [1] : vector<16x32xf32> to vector<16xf32>
    %393 = vector.shape_cast %392 : vector<16xf32> to vector<16x1xf32>
    %cst_151 = arith.constant 3.200000e+01 : f32
    %394 = vector.broadcast %cst_151 : f32 to vector<16x1xf32>
    %395 = arith.divf %393, %394 : vector<16x1xf32>
    %396 = vector.broadcast %395 : vector<16x1xf32> to vector<16x32xf32>
    %397 = arith.subf %389, %396 : vector<16x32xf32>
    %398 = vector.broadcast %395 : vector<16x1xf32> to vector<16x32xf32>
    %399 = arith.subf %389, %398 : vector<16x32xf32>
    %400 = arith.mulf %397, %399 : vector<16x32xf32>
    %cst_152 = arith.constant dense<0.000000e+00> : vector<16xf32>
    %401 = vector.multi_reduction <add>, %400, %cst_152 [1] : vector<16x32xf32> to vector<16xf32>
    %402 = vector.shape_cast %401 : vector<16xf32> to vector<16x1xf32>
    %cst_153 = arith.constant 3.200000e+01 : f32
    %403 = vector.broadcast %cst_153 : f32 to vector<16x1xf32>
    %404 = arith.divf %402, %403 : vector<16x1xf32>
    %405 = vector.broadcast %395 : vector<16x1xf32> to vector<16x32xf32>
    %406 = arith.subf %389, %405 : vector<16x32xf32>
    %cst_154 = arith.constant 9.99999996E-13 : f32
    %407 = vector.broadcast %cst_154 : f32 to vector<16x1xf32>
    %408 = arith.addf %404, %407 : vector<16x1xf32>
    %409 = math.rsqrt %408 : vector<16x1xf32>
    %410 = vector.broadcast %409 : vector<16x1xf32> to vector<16x32xf32>
    %411 = arith.mulf %406, %410 : vector<16x32xf32>
    %412 = vector.broadcast %390 : vector<1x32xf32> to vector<16x32xf32>
    %413 = arith.mulf %411, %412 : vector<16x32xf32>
    %414 = vector.broadcast %391 : vector<1x32xf32> to vector<16x32xf32>
    %415 = arith.addf %413, %414 : vector<16x32xf32>
    %c0_155 = arith.constant 0 : index
    %c0_156 = arith.constant 0 : index
    %416 = vector.load %arg4[%c0_155, %c0_156] : memref<64x128xf32, #tpu.memory_space<vmem>>, vector<32x32xf32>
    %cst_157 = arith.constant dense<0.000000e+00> : vector<16x32xf32>
    %417 = tpu.matmul %415, %416, %cst_157 {dimension_numbers = #tpu.dot_dimension_numbers<[1], [0], [0], [1], [0, 0, 1, 1], [], []>} : vector<16x32xf32>, vector<32x32xf32>, vector<16x32xf32> -> vector<16x32xf32>
    %c2 = arith.constant 2 : index
    %c0_158 = arith.constant 0 : index
    %418 = vector.load %arg3[%c2, %c0_158] : memref<32x128xf32, #tpu.memory_space<vmem>>, vector<1x32xf32>
    %419 = vector.broadcast %418 : vector<1x32xf32> to vector<16x32xf32>
    %420 = arith.addf %417, %419 : vector<16x32xf32>
    %421 = math.tanh %420 : vector<16x32xf32>
    %c32_159 = arith.constant 32 : index
    %c0_160 = arith.constant 0 : index
    %422 = vector.load %arg4[%c32_159, %c0_160] : memref<64x128xf32, #tpu.memory_space<vmem>>, vector<32x128xf32>
    %cst_161 = arith.constant dense<0.000000e+00> : vector<16x128xf32>
    %423 = tpu.matmul %421, %422, %cst_161 {dimension_numbers = #tpu.dot_dimension_numbers<[1], [0], [0], [1], [0, 0, 1, 1], [], []>} : vector<16x32xf32>, vector<32x128xf32>, vector<16x128xf32> -> vector<16x128xf32>
    %c3 = arith.constant 3 : index
    %c0_162 = arith.constant 0 : index
    %424 = vector.load %arg3[%c3, %c0_162] : memref<32x128xf32, #tpu.memory_space<vmem>>, vector<1x128xf32>
    %425 = vector.broadcast %424 : vector<1x128xf32> to vector<16x128xf32>
    %426 = arith.addf %423, %425 : vector<16x128xf32>
    %c0_163 = arith.constant 0 : index
    %c0_164 = arith.constant 0 : index
    %427 = vector.load %arg5[%c0_163, %c0_164] : memref<16x128xf32, #tpu.memory_space<vmem>>, vector<16x128xf32>
    tpu.vector_store %arg5[%c0_163, %c0_164], %426 {strides = array<i32>} : memref<16x128xf32, #tpu.memory_space<vmem>>, vector<16x128xf32>,
    return
  }
}

</mosaic_0001>

<bundles_post_ra>
// kernel: forward.1
= control target key start
LH: loop header
LB: loop body
LE: loop exit
PB: predicated region body
PF: predicated region fallthrough
CT: control target
= control target key end

     0   :  { %10 = vsyncpa [#allocation3], 0  ;;  %s1746_s21 = smov [#allocation2]   ;;  %s1747_s23 = smov 128   ;;  %s2126_s0 = inlined_call_operand.vmem [shape: f32[16,32], index: 0, kind: input, shape index: {}]   ;;  %s2127_s1 = inlined_call_operand.vmem [shape: f32[2,8], index: 1, kind: input, shape index: {}]   ;;  %s2128_s2 = inlined_call_operand.hbm [shape: f32[2,256,128], index: 2, kind: input, shape index: {}]   ;;  %s2129_s3 = inlined_call_operand.vmem [shape: f32[32,128], index: 3, kind: input, shape index: {}]   ;;  %s2130_s4 = inlined_call_operand.vmem [shape: f32[64,128], index: 4, kind: input, shape index: {}]   ;;  %s2131_s5 = inlined_call_operand.vmem [shape: f32[16,128], index: 5, kind: output, shape index: {}]  }
   0x1   :  { %s19_s20 = sshll.u32 %s2128_s2, 4  ;;  %s21_s22 = sshll.u32 %s1746_s21, 4  ;;  %s20_s20 = int_to_ptr.hbm [resolvable:$true] %s19_s20  ;;  %s22_s22 = int_to_ptr.vmem [resolvable:$true] %s21_s22 }
   0x2   :  { %s1748_s24 = smov 8  }
   0x3   :  { %27 = dma.hbm_to_vmem [thread:$0]  %s20_s20, 8192, %s22_s22, [#allocation3], %s1747_s23, %s1747_s23, %s1748_s24  }
   0x4   :  { %1744 = dma.done.wait [#allocation3], 8192  }
   0x5   :  { %1745 = vsyncadd [#allocation3], 4294959104  ;;  %vm40_vm0 = vcmask 261120   ;;  %v36_v0 = vld [vmem:[%s2126_s0] sm:$0xff]  ;;  %v37_v1 = vld [vmem:[%s2126_s0 + $0x8] sm:$0xff]  ;;  %v1749_v4 = vmov 32.0  }
   0x6   :  { %v41_v2 = vsel %vm40_vm0, %v36_v0, 0.0  ;;  %v44_v3 = vsel %vm40_vm0, %v37_v1, 0.0  ;;  %1654 = vrcp.f32 %v1749_v4  ;;  %v104_v21 = vld [vmem:[#allocation2 + $0x18] sm:$0xff]  ;;  %v103_v22 = vld [vmem:[#allocation2 + $0x10] sm:$0xff]  ;;  %v102_v23 = vld [vmem:[#allocation2 + $0x8] sm:$0xff]  ;;  %s1750_s8 = smov 112  }
   0x7   :  { %42 = vadd.xlane.f32.xlu0 %v41_v2  ;;  %45 = vadd.xlane.f32.xlu1 %v44_v3  ;;  %v101_v24 = vld [vmem:[#allocation2] sm:$0xff]  ;;  %s1751_s9 = smov 96   ;;  %s1752_s10 = smov 64   ;;  %vm139_vm8 = vcmask 130048   ;;  %vm164_vm9 = vcmask 64512   ;;  %vm632_vm13 = vcmask 523264  }
   0x8   :  { %125 = vmatpush.msra.mxu0 %v104_v21  ;;  %v1626_v42 = vld [vmem:[%s2129_s3] ss:$0 sm:$0xff]  ;;  %v1627_v46 = vld [vmem:[%s2129_s3 + $0x1] ss:$0 sm:$0xff]  ;;  %v1628_v53 = vld [vmem:[%s2129_s3 + $0x4] ss:$0 sm:$0xff] }
   0x9   :  { %s1753_s11 = smov 80   ;;  %v98_v62 = vld [vmem:[%s2127_s1] sm:$0x3]  ;;  %s1754_s1 = smov 48  }
   0xa   :  { %126 = vmatpush.msra.mxu0 %v103_v22  ;;  %v1839_v63 = vperm.slane %v98_v62, 0  ;;  %v1854_v21 = vperm.slane %v98_v62, 1  ;;  %s1755_s14 = smov 16   ;;  %v442_v62 = vld [vmem:[#allocation2 + $0x48] sm:$0xff] }
   0xc   :  { %v1655_v5 = vpop.eup %1654  ;;  %127 = vmatpush.msra.mxu0 %v102_v23 }
   0xd   :  { %v48_v6 = vmul.f32 32.0, %v1655_v5  ;;  %vm52_vm1 = vweird.f32 %v1655_v5 }
   0xe   :  { %128 = vmatpush.msra.mxu0 %v101_v24 }
   0xf   :  { %v49_v7 = vsub.f32 1.0, %v48_v6 }
  0x11   :  { %v50_v8 = vmul.f32 %v1655_v5, %v49_v7 }
  0x13   :  { %v51_v9 = vadd.f32 %v1655_v5, %v50_v8 }
  0x15   :  { %v1797_v10 = vsel %vm52_vm1, %v1655_v5, %v51_v9 }
  0x7a   :  { %v43_v11 = vpop.xlane.xlu0 %42  ;;  %v46_v12 = vpop.xlane.xlu1 %45 }
  0x7b   :  { %v54_v13 = vmul.f32 %v1797_v10, %v43_v11  ;;  %v55_v14 = vmul.f32 %v1797_v10, %v46_v12 }
  0x7d   :  { %v56_v15 = vsub.f32 %v36_v0, %v54_v13  ;;  %v57_v16 = vsub.f32 %v37_v1, %v55_v14 }
  0x7f   :  { %v58_v17 = vmul.f32 %v56_v15, %v56_v15  ;;  %v59_v18 = vmul.f32 %v57_v16, %v57_v16 }
  0x81   :  { %v60_v19 = vsel %vm40_vm0, %v58_v17, 0.0  ;;  %v63_v20 = vsel %vm40_vm0, %v59_v18, 0.0 }
  0x82   :  { %61 = vadd.xlane.f32.xlu0 %v60_v19  ;;  %64 = vadd.xlane.f32.xlu1 %v63_v20 }
  0xf5   :  { %v62_v25 = vpop.xlane.xlu0 %61  ;;  %v65_v26 = vpop.xlane.xlu1 %64 }
  0xf6   :  { %v66_v27 = vmul.f32 %v62_v25, %v1797_v10  ;;  %v67_v28 = vmul.f32 %v65_v26, %v1797_v10 }
  0xf8   :  { %v68_v29 = vadd.f32 1e-12, %v66_v27  ;;  %v69_v30 = vadd.f32 1e-12, %v67_v28 }
  0xfa   :  { %1656 = vrsqrt.f32 %v68_v29  ;;  %vm86_vm2 = vweird.f32 %v69_v30  ;;  %vm76_vm5 = vweird.f32 %v68_v29 }
  0xfb   :  { %1658 = vrsqrt.f32 %v69_v30 }
 0x100   :  { %v1657_v31 = vpop.eup %1656 }
 0x101   :  { %v1659_v32 = vpop.eup %1658  ;;  %v71_v33 = vmul.f32 %v1657_v31, %v68_v29  ;;  %vm77_vm4 = vweird.f32 %v1657_v31 }
 0x102   :  { %v81_v34 = vmul.f32 %v1659_v32, %v69_v30  ;;  %vm87_vm3 = vweird.f32 %v1659_v32  ;;  %vm78_vm7 = vmor %vm76_vm5, %vm77_vm4 }
 0x103   :  { %v72_v35 = vmul.f32 %v1657_v31, %v71_v33  ;;  %vm88_vm6 = vmor %vm86_vm2, %vm87_vm3 }
 0x104   :  { %v82_v36 = vmul.f32 %v1659_v32, %v81_v34 }
 0x105   :  { %v73_v37 = vmul.f32 0.5, %v72_v35 }
 0x106   :  { %v83_v38 = vmul.f32 0.5, %v82_v36 }
 0x107   :  { %v74_v39 = vsub.f32 1.5, %v73_v37 }
 0x108   :  { %v84_v40 = vsub.f32 1.5, %v83_v38 }
 0x109   :  { %v75_v41 = vmul.f32 %v1657_v31, %v74_v39 }
 0x10a   :  { %v85_v43 = vmul.f32 %v1659_v32, %v84_v40 }
 0x10b   :  { %v79_v44 = vsel %vm78_vm7, %v1657_v31, %v75_v41 }
 0x10c   :  { %v90_v45 = vmul.f32 %v79_v44, %v56_v15  ;;  %v89_v47 = vsel %vm88_vm6, %v1659_v32, %v85_v43 }
 0x10d   :  { %v91_v49 = vmul.f32 %v89_v47, %v57_v16 }
 0x10e   :  { %v93_v48 = vmul.f32 %v1626_v42, %v90_v45  ;;  %v409_v45 = vld [vmem:[#allocation2 + $0x38] sm:$0xff] }
 0x10f   :  { %v94_v51 = vmul.f32 %v1626_v42, %v91_v49 }
 0x110   :  { %v1811_v50 = vadd.f32 %v1627_v46, %v93_v48  ;;  %v407_v48 = vld [vmem:[#allocation2 + $0x28] sm:$0xff] }
 0x111   :  { %v1815_v52 = vadd.f32 %v1627_v46, %v94_v51  ;;  %v408_v46 = vld [vmem:[#allocation2 + $0x30] sm:$0xff]  ;;  %v406_v51 = vld [vmem:[#allocation2 + $0x20] sm:$0xff] }
 0x112   :  { %1556 = vmatmul.msk.f32.vlgmr.msra.gmra.mxu0 %vm40_vm0, %v1811_v50 }
 0x11a   :  { %1557 = vmatmul.msk.f32.gmra.mxu0 %vm40_vm0, %v1815_v52 }
 0x18f   :  { %v130_v54 = vpop.f32.mrf.mxu0 }
 0x190   :  { %v131_v55 = vadd.f32 %v1628_v53, %v130_v54 }
 0x192   :  { %202 = vrot.lane.b32.xlu0 %v131_v55, %s1750_s8  ;;  %137 = vrot.lane.b32.xlu2 %v131_v55, %s1751_s9 }
 0x197   :  { %v133_v56 = vpop.f32.mrf.mxu0 }
 0x198   :  { %v1826_v57 = vadd.f32 %v1628_v53, %v133_v56 }
 0x19a   :  { %176 = vrot.lane.b32.xlu0 %v131_v55, %s1752_s10  ;;  %204 = vrot.lane.b32.xlu2 %v131_v55, %s1753_s11 }
 0x1a2   :  { %338 = vrot.lane.b32.xlu0 %v1826_v57, %s1753_s11 }
 0x1aa   :  { %336 = vrot.lane.b32.xlu0 %v1826_v57, %s1750_s8 }
 0x1ec   :  { %v138_v58 = vpop.permute.xlu2 %137 }
 0x1ed   :  { %1558 = vmatpush.xpose.msk.msra.mxu1 %vm139_vm8, %v138_v58 }
 0x1f0   :  { %1559 = vmatmul.msk.f32.vlgmr.msra.gmra.mxu1 %vm139_vm8, %v131_v55 }
 0x1f4   :  { %v205_v59 = vpop.permute.xlu2 %204 }
 0x1f5   :  { %1561 = vmatpush.xpose.msk.msrb.mxu0 %vm139_vm8, %v205_v59  ;;  %v444_v59 = vld [vmem:[#allocation2 + $0x58] sm:$0xff] }
 0x1f9   :  { %468 = vmatpush.msra.mxu0 %v444_v59  ;;  %v629_v59 = vld [vmem:[#allocation2 + $0xc8] sm:$0xff] }
 0x204   :  { %v203_v60 = vpop.permute.xlu0 %202 }
 0x205   :  { %1562 = vmatmul.msk.f32.vlgmr.msrb.gmra.mxu0 %vm139_vm8, %v203_v60  ;;  %v443_v60 = vld [vmem:[#allocation2 + $0x50] sm:$0xff] }
 0x206   :  { %469 = vmatpush.msra.mxu0 %v443_v60  ;;  %v628_v60 = vld [vmem:[#allocation2 + $0xc0] sm:$0xff] }
 0x208   :  { %470 = vmatpush.msra.mxu0 %v442_v62  ;;  %v626_v62 = vld [vmem:[#allocation2 + $0xb0] sm:$0xff] }
 0x20c   :  { %v177_v61 = vpop.permute.xlu0 %176 }
 0x20d   :  { %197 = vmatpush.msra.mxu2 %v177_v61 }
 0x214   :  { %v339_v27 = vpop.permute.xlu0 %338 }
 0x21c   :  { %v337_v30 = vpop.permute.xlu0 %336 }
 0x26d   :  { %v161_v0 = vpop.f32.mrf.mxu1 }
 0x26e   :  { %v162_v1 = vadd.f32 %v161_v0, %v1839_v63  ;;  %v441_v0 = vld [vmem:[#allocation2 + $0x40] sm:$0xff] }
 0x26f   :  { %471 = vmatpush.msra.mxu0 %v441_v0  ;;  %v625_v0 = vld [vmem:[#allocation2 + $0xa8] sm:$0xff] }
 0x270   :  { %v165_v2 = vsel %vm164_vm9, %v162_v1, -inf }
 0x271   :  { %166 = vmax.xlane.f32.xlu1 %v165_v2 }
 0x282   :  { %v227_v3 = vpop.f32.mrf.mxu0 }
 0x283   :  { %v228_v4 = vadd.f32 %v227_v3, %v1839_v63 }
 0x285   :  { %v230_v5 = vsel %vm164_vm9, %v228_v4, -inf }
 0x286   :  { %231 = vmax.xlane.f32.xlu2 %v230_v5 }
 0x29e   :  { %273 = vrot.lane.b32.xlu2 %v1826_v57, %s1751_s9 }
 0x2e4   :  { %v167_v6 = vpop.xlane.xlu1 %166 }
 0x2e5   :  { %v168_v7 = vsub.f32 %v162_v1, %v167_v6 }
 0x2e7   :  { %v169_v8 = vmul.f32 1.442695, %v168_v7  ;;  %v447_v7 = vld [vmem:[#allocation2 + $0x68] sm:$0xff] }
 0x2e9   :  { %1660 = vpow2.f32 %v169_v8  ;;  %v446_v8 = vld [vmem:[#allocation2 + $0x60] sm:$0xff] }
 0x2ef   :  { %v1661_v9 = vpop.eup %1660 }
 0x2f0   :  { %v171_v11 = vsel %vm164_vm9, %v1661_v9, 0.0 }
 0x2f1   :  { %172 = vadd.xlane.f32.xlu1 %v171_v11  ;;  %v1630_v11 = vld [vmem:[%s2129_s3 + $0x6] ss:$0 sm:$0xff] }
 0x2f9   :  { %v232_v12 = vpop.xlane.xlu2 %231 }
 0x2fa   :  { %v233_v13 = vsub.f32 %v228_v4, %v232_v12  ;;  %v1629_v4 = vld [vmem:[%s2129_s3 + $0x5] ss:$0 sm:$0xff] }
 0x2fc   :  { %v234_v14 = vmul.f32 1.442695, %v233_v13 }
 0x2fe   :  { %1662 = vpow2.f32 %v234_v14 }
 0x301   :  { %v274_v15 = vpop.permute.xlu2 %273 }
 0x302   :  { %1564 = vmatpush.xpose.msk.msrb.mxu1 %vm139_vm8, %v274_v15 }
 0x304   :  { %v1663_v16 = vpop.eup %1662 }
 0x305   :  { %1565 = vmatmul.msk.f32.vlgmr.msrb.gmra.mxu1 %vm139_vm8, %v1826_v57  ;;  %v236_v17 = vsel %vm164_vm9, %v1663_v16, 0.0 }
 0x306   :  { %237 = vadd.xlane.f32.xlu1 %v236_v17  ;;  %v1631_v17 = vld [vmem:[%s2129_s3 + $0x7] ss:$0 sm:$0xff] }
 0x31f   :  { %241 = vrot.lane.b32.xlu1 %v131_v55, %s1754_s1 }
 0x364   :  { %v173_v18 = vpop.xlane.xlu1 %172 }
 0x365   :  { %1664 = vrcp.f32 %v173_v18 }
 0x36b   :  { %v1665_v19 = vpop.eup %1664 }
 0x36c   :  { %v175_v20 = vmul.f32 %v1665_v19, %v1661_v9 }
 0x36e   :  { %1560 = vmatmul.msk.f32.vlgmr.msra.gmra.mxu2 %vm164_vm9, %v175_v20 }
 0x379   :  { %v238_v24 = vpop.xlane.xlu1 %237 }
 0x37a   :  { %1666 = vrcp.f32 %v238_v24 }
 0x380   :  { %v1667_v26 = vpop.eup %1666 }
 0x381   :  { %v240_v29 = vmul.f32 %v1667_v26, %v1663_v16 }
 0x382   :  { %v296_v22 = vpop.f32.mrf.mxu1 }
 0x383   :  { %v297_v23 = vadd.f32 %v296_v22, %v1854_v21 }
 0x385   :  { %v299_v25 = vsel %vm164_vm9, %v297_v23, -inf }
 0x386   :  { %300 = vmax.xlane.f32.xlu1 %v299_v25 }
 0x391   :  { %v242_v28 = vpop.permute.xlu1 %241 }
 0x392   :  { %262 = vmatpush.msrb.mxu2 %v242_v28 }
 0x393   :  { %1563 = vmatmul.msk.f32.vlgmr.msrb.gmra.mxu2 %vm164_vm9, %v240_v29 }
 0x394   :  { %1567 = vmatpush.xpose.msk.msra.mxu2 %vm139_vm8, %v339_v27 }
 0x398   :  { %501 = vmatpush.msrb.mxu2 %v447_v7 }
 0x39a   :  { %502 = vmatpush.msrb.mxu2 %v446_v8 }
 0x39b   :  { %1568 = vmatmul.msk.f32.vlgmr.msra.gmra.mxu2 %vm139_vm8, %v337_v30 }
 0x3f1   :  { %v199_v36 = vpop.f32.mrf.mxu2 }
 0x3f9   :  { %v301_v31 = vpop.xlane.xlu1 %300 }
 0x3fa   :  { %v302_v32 = vsub.f32 %v297_v23, %v301_v31 }
 0x3fc   :  { %v303_v33 = vmul.f32 1.442695, %v302_v32 }
 0x3fe   :  { %1668 = vpow2.f32 %v303_v33 }
 0x404   :  { %v1669_v34 = vpop.eup %1668 }
 0x405   :  { %v305_v35 = vsel %vm164_vm9, %v1669_v34, 0.0 }
 0x406   :  { %306 = vadd.xlane.f32.xlu1 %v305_v35  ;;  %v570_v35 = vld [vmem:[#allocation2 + $0x78] sm:$0xff] }
 0x416   :  { %v264_v37 = vpop.f32.mrf.mxu2 }
 0x41e   :  { %v361_v38 = vpop.f32.mrf.mxu2 }
 0x41f   :  { %v362_v39 = vadd.f32 %v361_v38, %v1854_v21  ;;  %310 = vrot.lane.b32.xlu1 %v1826_v57, %s1752_s10 }
 0x421   :  { %v364_v40 = vsel %vm164_vm9, %v362_v39, -inf }
 0x422   :  { %365 = vmax.xlane.f32.xlu0 %v364_v40 }
 0x436   :  { %375 = vrot.lane.b32.xlu0 %v1826_v57, %s1754_s1 }
 0x43e   :  { %268 = vrot.lane.b32.xlu0 %v264_v37, %s1755_s14 }
 0x479   :  { %v307_v41 = vpop.xlane.xlu1 %306 }
 0x47a   :  { %1670 = vrcp.f32 %v307_v41 }
 0x480   :  { %v1671_v42 = vpop.eup %1670 }
 0x481   :  { %v309_v44 = vmul.f32 %v1671_v42, %v1669_v34  ;;  %v571_v34 = vld [vmem:[#allocation2 + $0x80] sm:$0xff] }
 0x491   :  { %v311_v43 = vpop.permute.xlu1 %310 }
 0x492   :  { %331 = vmatpush.msra.mxu3 %v311_v43 }
 0x493   :  { %1566 = vmatmul.msk.f32.vlgmr.msra.gmra.mxu3 %vm164_vm9, %v309_v44 }
 0x494   :  { %430 = vmatpush.msrb.mxu3 %v409_v45 }
 0x495   :  { %v366_v47 = vpop.xlane.xlu0 %365 }
 0x496   :  { %v367_v49 = vsub.f32 %v362_v39, %v366_v47  ;;  %431 = vmatpush.msrb.mxu3 %v408_v46  ;;  %v1898_v46 = vld [vmem:[%s2129_s3 + $0x8] ss:$0 sm:$0xff] }
 0x498   :  { %v368_v53 = vmul.f32 1.442695, %v367_v49  ;;  %432 = vmatpush.msrb.mxu3 %v407_v48  ;;  %v1903_v49 = vld [vmem:[%s2129_s3 + $0x9] ss:$0 sm:$0xff] }
 0x49a   :  { %1672 = vpow2.f32 %v368_v53  ;;  %433 = vmatpush.msrb.mxu3 %v406_v51 }
 0x49c   :  { %647 = vmatpush.msra.mxu3 %v629_v59 }
 0x49e   :  { %648 = vmatpush.msra.mxu3 %v628_v60 }
 0x4a0   :  { %v1673_v54 = vpop.eup %1672 }
 0x4a1   :  { %v370_v55 = vsel %vm164_vm9, %v1673_v54, 0.0 }
 0x4a2   :  { %371 = vadd.xlane.f32.xlu2 %v370_v55 }
 0x4a8   :  { %v376_v56 = vpop.permute.xlu0 %375 }
 0x4a9   :  { %396 = vmatpush.msra.mxu1 %v376_v56 }
 0x4b0   :  { %v269_v57 = vpop.permute.xlu0 %268 }
 0x4b1   :  { %v271_v58 = vsel %vm139_vm8, %v199_v36, %v269_v57  ;;  %v569_v36 = vld [vmem:[#allocation2 + $0x70] sm:$0xff] }
 0x4b2   :  { %1570 = vmatmul.msk.f32.vlgmr.msrb.gmra.mxu3 %vm40_vm0, %v271_v58 }
 0x515   :  { %v372_v61 = vpop.xlane.xlu2 %371 }
 0x516   :  { %1674 = vrcp.f32 %v372_v61  ;;  %v333_v3 = vpop.f32.mrf.mxu3  ;;  %v627_v61 = vld [vmem:[#allocation2 + $0xb8] sm:$0xff] }
 0x517   :  { %649 = vmatpush.msra.mxu3 %v627_v61  ;;  %v1637_v61 = vld [vmem:[%s2129_s3 + $0xd] ss:$0 sm:$0xff] }
 0x519   :  { %650 = vmatpush.msra.mxu3 %v626_v62 }
 0x51b   :  { %651 = vmatpush.msra.mxu3 %v625_v0 }
 0x51c   :  { %v1675_v1 = vpop.eup %1674 }
 0x51d   :  { %v374_v2 = vmul.f32 %v1675_v1, %v1673_v54  ;;  %v624_v1 = vld [vmem:[#allocation2 + $0xa0] sm:$0xff] }
 0x51e   :  { %652 = vmatpush.msra.mxu3 %v624_v1 }
 0x51f   :  { %1569 = vmatmul.msk.f32.vlgmr.msra.gmra.mxu1 %vm164_vm9, %v374_v2  ;;  %v623_v2 = vld [vmem:[#allocation2 + $0x98] sm:$0xff] }
 0x520   :  { %653 = vmatpush.msra.mxu3 %v623_v2 }
 0x535   :  { %v435_v5 = vpop.f32.mrf.mxu3 }
 0x536   :  { %v436_v6 = vadd.f32 %v1629_v4, %v435_v5 }
 0x538   :  { %1572 = vmatmul.msk.f32.vlgmr.msra.gmra.mxu0 %vm40_vm0, %v436_v6 }
 0x59c   :  { %v398_v9 = vpop.f32.mrf.mxu1 }
 0x59d   :  { %402 = vrot.lane.b32.xlu2 %v398_v9, %s1755_s14 }
 0x5b5   :  { %v473_v12 = vpop.f32.mrf.mxu0 }
 0x5b6   :  { %v474_v13 = vadd.f32 %v1630_v11, %v473_v12 }
 0x5b8   :  { %v479_v14 = vmax.f32 %v474_v13, 0.0 }
 0x5ba   :  { %1574 = vmatmul.msk.f32.vlgmr.msrb.gmra.mxu2 %vm139_vm8, %v479_v14 }
 0x5f7   :  { %v403_v15 = vpop.permute.xlu2 %402 }
 0x5f8   :  { %v405_v16 = vsel %vm139_vm8, %v333_v3, %v403_v15  ;;  %v622_v3 = vld [vmem:[#allocation2 + $0x90] sm:$0xff] }
 0x5f9   :  { %1571 = vmatmul.msk.f32.gmra.mxu3 %vm40_vm0, %v405_v16  ;;  %v665_v16 = vld [vmem:[#allocation2 + $0xe8] sm:$0xff] }
 0x5fa   :  { %654 = vmatpush.msra.mxu3 %v622_v3  ;;  %689 = vmatpush.msrb.mxu0 %v665_v16  ;;  %v791_v16 = vld [vmem:[#allocation2 + $0x100] sm:$0xff] }
 0x63d   :  { %v504_v18 = vpop.f32.mrf.mxu2 }
 0x63e   :  { %v510_v19 = vadd.f32 %v504_v18, %v436_v6 }
 0x640   :  { %v513_v20 = vadd.f32 %v1631_v17, %v510_v19 }
 0x642   :  { %v515_v22 = vadd.f32 %v513_v20, %v1811_v50  ;;  %v572_v50 = vld [vmem:[#allocation2 + $0x88] sm:$0xff] }
 0x643   :  { %593 = vmatpush.msrb.mxu1 %v572_v50 }
 0x644   :  { %v519_v23 = vsel %vm40_vm0, %v515_v22, 0.0 }
 0x645   :  { %520 = vadd.xlane.f32.xlu0 %v519_v23  ;;  %594 = vmatpush.msrb.mxu1 %v571_v34 }
 0x647   :  { %595 = vmatpush.msrb.mxu1 %v570_v35 }
 0x649   :  { %596 = vmatpush.msrb.mxu1 %v569_v36 }
 0x67c   :  { %v438_v24 = vpop.f32.mrf.mxu3 }
 0x67d   :  { %v439_v25 = vadd.f32 %v1629_v4, %v438_v24  ;;  %v663_v24 = vld [vmem:[#allocation2 + $0xd8] sm:$0xff] }
 0x67f   :  { %1573 = vmatmul.msk.f32.gmra.mxu0 %vm40_vm0, %v439_v25 }
 0x6b8   :  { %v521_v26 = vpop.xlane.xlu0 %520 }
 0x6b9   :  { %v525_v27 = vmul.f32 %v521_v26, %v1797_v10  ;;  %v1635_v26 = vld [vmem:[%s2129_s3 + $0xb] ss:$0 sm:$0xff] }
 0x6bb   :  { %v527_v28 = vsub.f32 %v515_v22, %v525_v27 }
 0x6bd   :  { %v529_v29 = vmul.f32 %v527_v28, %v527_v28 }
 0x6bf   :  { %v531_v30 = vsel %vm40_vm0, %v529_v29, 0.0 }
 0x6c0   :  { %532 = vadd.xlane.f32.xlu2 %v531_v30 }
 0x6fc   :  { %v476_v31 = vpop.f32.mrf.mxu0 }
 0x6fd   :  { %v477_v32 = vadd.f32 %v1630_v11, %v476_v31 }
 0x6ff   :  { %v480_v33 = vmax.f32 %v477_v32, 0.0 }
 0x701   :  { %1575 = vmatmul.msk.f32.gmra.mxu2 %vm139_vm8, %v480_v33 }
 0x733   :  { %v533_v37 = vpop.xlane.xlu2 %532 }
 0x734   :  { %v537_v38 = vmul.f32 %v533_v37, %v1797_v10 }
 0x736   :  { %v539_v39 = vadd.f32 1e-12, %v537_v38 }
 0x738   :  { %1676 = vrsqrt.f32 %v539_v39  ;;  %vm547_vm11 = vweird.f32 %v539_v39 }
 0x73e   :  { %v1677_v40 = vpop.eup %1676 }
 0x73f   :  { %v542_v41 = vmul.f32 %v1677_v40, %v539_v39  ;;  %vm548_vm10 = vweird.f32 %v1677_v40 }
 0x740   :  { %vm549_vm12 = vmor %vm547_vm11, %vm548_vm10 }
 0x741   :  { %v543_v42 = vmul.f32 %v1677_v40, %v542_v41  ;;  %v668_v41 = vld [vmem:[#allocation2 + $0xf8] sm:$0xff] }
 0x742   :  { %722 = vmatpush.msra.mxu2 %v668_v41 }
 0x743   :  { %v544_v43 = vmul.f32 0.5, %v543_v42  ;;  %v667_v42 = vld [vmem:[#allocation2 + $0xf0] sm:$0xff] }
 0x744   :  { %723 = vmatpush.msra.mxu2 %v667_v42 }
 0x745   :  { %v545_v44 = vsub.f32 1.5, %v544_v43  ;;  %v1636_v43 = vld [vmem:[%s2129_s3 + $0xc] ss:$0 sm:$0xff] }
 0x747   :  { %v546_v45 = vmul.f32 %v1677_v40, %v545_v44 }
 0x749   :  { %v550_v47 = vsel %vm549_vm12, %v1677_v40, %v546_v45 }
 0x74a   :  { %v561_v48 = vmul.f32 %v550_v47, %v527_v28 }
 0x74c   :  { %v564_v51 = vmul.f32 %v1898_v46, %v561_v48 }
 0x74e   :  { %v1907_v53 = vadd.f32 %v1903_v49, %v564_v51 }
 0x750   :  { %1576 = vmatmul.msk.f32.vlgmr.msrb.gmra.mxu1 %vm40_vm0, %v1907_v53 }
 0x784   :  { %v507_v54 = vpop.f32.mrf.mxu2 }
 0x785   :  { %v511_v55 = vadd.f32 %v507_v54, %v439_v25  ;;  %v662_v25 = vld [vmem:[#allocation2 + $0xd0] sm:$0xff] }
 0x787   :  { %v514_v56 = vadd.f32 %v1631_v17, %v511_v55  ;;  %v664_v17 = vld [vmem:[#allocation2 + $0xe0] sm:$0xff] }
 0x788   :  { %690 = vmatpush.msrb.mxu0 %v664_v17 }
 0x789   :  { %v516_v57 = vadd.f32 %v514_v56, %v1815_v52  ;;  %v1634_v52 = vld [vmem:[%s2129_s3 + $0xa] ss:$0 sm:$0xff] }
 0x78a   :  { %691 = vmatpush.msrb.mxu0 %v663_v24 }
 0x78b   :  { %v522_v58 = vsel %vm40_vm0, %v516_v57, 0.0 }
 0x78c   :  { %523 = vadd.xlane.f32.xlu1 %v522_v58  ;;  %692 = vmatpush.msrb.mxu0 %v662_v25 }
 0x7cd   :  { %v598_v4 = vpop.f32.mrf.mxu1 }
 0x7ce   :  { %v599_v5 = vadd.f32 %v1634_v52, %v598_v4 }
 0x7d0   :  { %v606_v6 = vmul.f32 0.044715, %v599_v5  ;;  %v604_v13 = vmul.f32 0.5, %v599_v5 }
 0x7d2   :  { %v608_v7 = vmul.f32 %v606_v6, %v599_v5 }
 0x7d4   :  { %v610_v8 = vmul.f32 %v608_v7, %v599_v5 }
 0x7d6   :  { %v612_v9 = vadd.f32 %v610_v8, %v599_v5 }
 0x7d8   :  { %v614_v11 = vmul.f32 0.7978846, %v612_v9 }
 0x7da   :  { %1678 = vtanh.f32 %v614_v11 }
 0x7e0   :  { %v1679_v12 = vpop.eup %1678 }
 0x7e1   :  { %v618_v14 = vadd.f32 1.0, %v1679_v12 }
 0x7e3   :  { %v620_v15 = vmul.f32 %v618_v14, %v604_v13  ;;  %v793_v14 = vld [vmem:[#allocation2 + $0x110] sm:$0xff] }
 0x7e5   :  { %1578 = vmatmul.msk.f32.vlgmr.msra.gmra.mxu3 %vm632_vm13, %v620_v15  ;;  %v792_v15 = vld [vmem:[#allocation2 + $0x108] sm:$0xff] }
 0x7ff   :  { %v524_v18 = vpop.xlane.xlu1 %523 }
 0x800   :  { %v526_v19 = vmul.f32 %v524_v18, %v1797_v10 }
 0x802   :  { %v528_v20 = vsub.f32 %v516_v57, %v526_v19 }
 0x804   :  { %v530_v22 = vmul.f32 %v528_v20, %v528_v20 }
 0x806   :  { %v534_v23 = vsel %vm40_vm0, %v530_v22, 0.0 }
 0x807   :  { %535 = vadd.xlane.f32.xlu0 %v534_v23 }
 0x868   :  { %v656_v27 = vpop.f32.mrf.mxu3 }
 0x869   :  { %v657_v28 = vadd.f32 %v1635_v26, %v656_v27  ;;  %v1638_v27 = vld [vmem:[%s2129_s3 + $0xe] ss:$0 sm:$0xff] }
 0x86b   :  { %1580 = vmatmul.msk.f32.vlgmr.msrb.gmra.mxu0 %vm40_vm0, %v657_v28 }
 0x87a   :  { %v536_v29 = vpop.xlane.xlu0 %535 }
 0x87b   :  { %v538_v30 = vmul.f32 %v536_v29, %v1797_v10 }
 0x87d   :  { %v540_v31 = vadd.f32 1e-12, %v538_v30  ;;  %v1639_v30 = vld [vmem:[%s2129_s3 + $0xf] ss:$0 sm:$0xff] }
 0x87f   :  { %1680 = vrsqrt.f32 %v540_v31  ;;  %vm557_vm15 = vweird.f32 %v540_v31 }
 0x885   :  { %v1681_v32 = vpop.eup %1680 }
 0x886   :  { %v552_v33 = vmul.f32 %v1681_v32, %v540_v31  ;;  %vm558_vm14 = vweird.f32 %v1681_v32 }
 0x887   :  { %vm559_vm1 = vmor %vm557_vm15, %vm558_vm14 }
 0x888   :  { %v553_v50 = vmul.f32 %v1681_v32, %v552_v33 }
 0x88a   :  { %v554_v34 = vmul.f32 0.5, %v553_v50 }
 0x88c   :  { %v555_v35 = vsub.f32 1.5, %v554_v34 }
 0x88e   :  { %v556_v36 = vmul.f32 %v1681_v32, %v555_v35 }
 0x890   :  { %v560_v37 = vsel %vm559_vm1, %v1681_v32, %v556_v36 }
 0x891   :  { %v562_v38 = vmul.f32 %v560_v37, %v528_v20  ;;  %v1640_v37 = vld [vmem:[%s2129_s3 + $0x10] ss:$0 sm:$0xff] }
 0x893   :  { %v565_v39 = vmul.f32 %v1898_v46, %v562_v38 }
 0x895   :  { %v1926_v40 = vadd.f32 %v1903_v49, %v565_v39 }
 0x897   :  { %1577 = vmatmul.msk.f32.gmra.mxu1 %vm40_vm0, %v1926_v40 }
 0x8e8   :  { %v694_v44 = vpop.f32.mrf.mxu0 }
 0x8e9   :  { %v695_v45 = vadd.f32 %v1636_v43, %v694_v44 }
 0x8eb   :  { %v700_v47 = vmax.f32 %v695_v45, 0.0 }
 0x8ed   :  { %1582 = vmatmul.msk.f32.vlgmr.msra.gmra.mxu2 %vm139_vm8, %v700_v47 }
 0x914   :  { %v601_v46 = vpop.f32.mrf.mxu1 }
 0x915   :  { %v602_v48 = vadd.f32 %v1634_v52, %v601_v46 }
 0x917   :  { %v607_v49 = vmul.f32 0.044715, %v602_v48  ;;  %v605_v58 = vmul.f32 0.5, %v602_v48 }
 0x919   :  { %v609_v51 = vmul.f32 %v607_v49, %v602_v48 }
 0x91b   :  { %v611_v54 = vmul.f32 %v609_v51, %v602_v48 }
 0x91d   :  { %v613_v55 = vadd.f32 %v611_v54, %v602_v48 }
 0x91f   :  { %v615_v56 = vmul.f32 0.7978846, %v613_v55 }
 0x921   :  { %1682 = vtanh.f32 %v615_v56 }
 0x927   :  { %v1683_v57 = vpop.eup %1682 }
 0x928   :  { %v619_v59 = vadd.f32 1.0, %v1683_v57 }
 0x92a   :  { %v621_v60 = vmul.f32 %v619_v59, %v605_v58 }
 0x92c   :  { %1579 = vmatmul.msk.f32.gmra.mxu3 %vm632_vm13, %v621_v60 }
 0x970   :  { %v725_v62 = vpop.f32.mrf.mxu2 }
 0x971   :  { %v731_v0 = vadd.f32 %v725_v62, %v657_v28 }
 0x973   :  { %v734_v1 = vadd.f32 %v1637_v61, %v731_v0 }
 0x975   :  { %v736_v2 = vadd.f32 %v734_v1, %v1907_v53  ;;  %v794_v53 = vld [vmem:[#allocation2 + $0x118] sm:$0xff] }
 0x976   :  { %815 = vmatpush.msra.mxu1 %v794_v53 }
 0x977   :  { %v740_v3 = vsel %vm40_vm0, %v736_v2, 0.0 }
 0x978   :  { %741 = vadd.xlane.f32.xlu0 %v740_v3  ;;  %816 = vmatpush.msra.mxu1 %v793_v14 }
 0x97a   :  { %817 = vmatpush.msra.mxu1 %v792_v15 }
 0x97c   :  { %818 = vmatpush.msra.mxu1 %v791_v16 }
 0x9af   :  { %v659_v52 = vpop.f32.mrf.mxu3 }
 0x9b0   :  { %v660_v4 = vadd.f32 %v1635_v26, %v659_v52 }
 0x9b2   :  { %1581 = vmatmul.msk.f32.gmra.mxu0 %vm40_vm0, %v660_v4 }
 0x9eb   :  { %v742_v5 = vpop.xlane.xlu0 %741 }
 0x9ec   :  { %v746_v6 = vmul.f32 %v742_v5, %v1797_v10 }
 0x9ee   :  { %v748_v7 = vsub.f32 %v736_v2, %v746_v6 }
 0x9f0   :  { %v750_v8 = vmul.f32 %v748_v7, %v748_v7 }
 0x9f2   :  { %v752_v9 = vsel %vm40_vm0, %v750_v8, 0.0 }
 0x9f3   :  { %753 = vadd.xlane.f32.xlu2 %v752_v9 }
 0xa2f   :  { %v697_v11 = vpop.f32.mrf.mxu0 }
 0xa30   :  { %v698_v12 = vadd.f32 %v1636_v43, %v697_v11 }
 0xa32   :  { %v701_v13 = vmax.f32 %v698_v12, 0.0 }
 0xa34   :  { %1583 = vmatmul.msk.f32.gmra.mxu2 %vm139_vm8, %v701_v13 }
 0xa66   :  { %v754_v17 = vpop.xlane.xlu2 %753 }
 0xa67   :  { %v758_v18 = vmul.f32 %v754_v17, %v1797_v10 }
 0xa69   :  { %v760_v19 = vadd.f32 1e-12, %v758_v18 }
 0xa6b   :  { %1684 = vrsqrt.f32 %v760_v19  ;;  %vm768_vm3 = vweird.f32 %v760_v19 }
 0xa71   :  { %v1685_v20 = vpop.eup %1684 }
 0xa72   :  { %v763_v22 = vmul.f32 %v1685_v20, %v760_v19  ;;  %vm769_vm2 = vweird.f32 %v1685_v20 }
 0xa73   :  { %vm770_vm4 = vmor %vm768_vm3, %vm769_vm2 }
 0xa74   :  { %v764_v23 = vmul.f32 %v1685_v20, %v763_v22 }
 0xa76   :  { %v765_v24 = vmul.f32 0.5, %v764_v23 }
 0xa78   :  { %v766_v25 = vsub.f32 1.5, %v765_v24 }
 0xa7a   :  { %v767_v26 = vmul.f32 %v1685_v20, %v766_v25 }
 0xa7c   :  { %v771_v28 = vsel %vm770_vm4, %v1685_v20, %v767_v26 }
 0xa7d   :  { %v782_v29 = vmul.f32 %v771_v28, %v748_v7 }
 0xa7f   :  { %v785_v31 = vmul.f32 %v1638_v27, %v782_v29 }
 0xa81   :  { %v1951_v32 = vadd.f32 %v1639_v30, %v785_v31 }
 0xa83   :  { %1584 = vmatmul.msk.f32.vlgmr.msra.gmra.mxu1 %vm40_vm0, %v1951_v32 }
 0xab7   :  { %v728_v33 = vpop.f32.mrf.mxu2 }
 0xab8   :  { %v732_v50 = vadd.f32 %v728_v33, %v660_v4 }
 0xaba   :  { %v735_v34 = vadd.f32 %v1637_v61, %v732_v50 }
 0xabc   :  { %v737_v35 = vadd.f32 %v735_v34, %v1926_v40 }
 0xabe   :  { %v743_v36 = vsel %vm40_vm0, %v737_v35, 0.0 }
 0xabf   :  { %744 = vadd.xlane.f32.xlu1 %v743_v36 }
 0xb00   :  { %v820_v38 = vpop.f32.mrf.mxu1 }
 0xb01   :  { %v1960_v39 = vadd.f32 %v1640_v37, %v820_v38 }
 0xb03   :  { %890 = vrot.lane.b32.xlu2 %v1960_v39, %s1750_s8  ;;  %892 = vrot.lane.b32.xlu1 %v1960_v39, %s1753_s11 }
 0xb32   :  { %v745_v41 = vpop.xlane.xlu1 %744 }
 0xb33   :  { %v747_v42 = vmul.f32 %v745_v41, %v1797_v10 }
 0xb35   :  { %v749_v40 = vsub.f32 %v737_v35, %v747_v42 }
 0xb37   :  { %v751_v43 = vmul.f32 %v749_v40, %v749_v40 }
 0xb39   :  { %v755_v44 = vsel %vm40_vm0, %v751_v43, 0.0 }
 0xb3a   :  { %756 = vadd.xlane.f32.xlu0 %v755_v44 }
 0xb5d   :  { %v891_v47 = vpop.permute.xlu2 %890 }
 0xb75   :  { %v893_v45 = vpop.permute.xlu1 %892 }
 0xb76   :  { %1589 = vmatpush.xpose.msk.msrb.mxu2 %vm139_vm8, %v893_v45 }
 0xb79   :  { %1590 = vmatmul.msk.f32.vlgmr.msrb.gmra.mxu2 %vm139_vm8, %v891_v47 }
 0xbad   :  { %v757_v46 = vpop.xlane.xlu0 %756 }
 0xbae   :  { %v759_v48 = vmul.f32 %v757_v46, %v1797_v10 }
 0xbb0   :  { %v761_v49 = vadd.f32 1e-12, %v759_v48 }
 0xbb2   :  { %1686 = vrsqrt.f32 %v761_v49  ;;  %vm778_vm6 = vweird.f32 %v761_v49 }
 0xbb8   :  { %v1687_v51 = vpop.eup %1686 }
 0xbb9   :  { %v773_v54 = vmul.f32 %v1687_v51, %v761_v49  ;;  %vm779_vm5 = vweird.f32 %v1687_v51 }
 0xbba   :  { %vm780_vm7 = vmor %vm778_vm6, %vm779_vm5 }
 0xbbb   :  { %v774_v55 = vmul.f32 %v1687_v51, %v773_v54 }
 0xbbd   :  { %v775_v56 = vmul.f32 0.5, %v774_v55 }
 0xbbf   :  { %v776_v57 = vsub.f32 1.5, %v775_v56  ;;  %v1097_v56 = vld [vmem:[#allocation2 + $0x138] sm:$0xff] }
 0xbc1   :  { %v777_v58 = vmul.f32 %v1687_v51, %v776_v57  ;;  %v1096_v57 = vld [vmem:[#allocation2 + $0x130] sm:$0xff] }
 0xbc3   :  { %v781_v59 = vsel %vm780_vm7, %v1687_v51, %v777_v58  ;;  %v1095_v58 = vld [vmem:[#allocation2 + $0x128] sm:$0xff] }
 0xbc4   :  { %v783_v60 = vmul.f32 %v781_v59, %v749_v40  ;;  %v1094_v59 = vld [vmem:[#allocation2 + $0x120] sm:$0xff] }
 0xbc6   :  { %v786_v61 = vmul.f32 %v1638_v27, %v783_v60 }
 0xbc8   :  { %v1971_v62 = vadd.f32 %v1639_v30, %v786_v61 }
 0xbca   :  { %1585 = vmatmul.msk.f32.gmra.mxu1 %vm40_vm0, %v1971_v62 }
 0xbfc   :  { %v915_v2 = vpop.f32.mrf.mxu2 }
 0xbfd   :  { %v916_v3 = vadd.f32 %v915_v2, %v1839_v63  ;;  %v1132_v2 = vld [vmem:[#allocation2 + $0x158] sm:$0xff] }
 0xbff   :  { %v918_v52 = vsel %vm164_vm9, %v916_v3, -inf }
 0xc47   :  { %v823_v0 = vpop.f32.mrf.mxu1 }
 0xc48   :  { %v824_v1 = vadd.f32 %v1640_v37, %v823_v0 }
 0xc4a   :  { %961 = vrot.lane.b32.xlu2 %v824_v1, %s1751_s9  ;;  %1024 = vrot.lane.b32.xlu1 %v824_v1, %s1750_s8 }
 0xc4b   :  { %1026 = vrot.lane.b32.xlu0 %v824_v1, %s1753_s11 }
 0xc53   :  { %827 = vrot.lane.b32.xlu0 %v1960_v39, %s1751_s9 }
 0xc74   :  { %919 = vmax.xlane.f32.xlu1 %v918_v52  ;;  %v1130_v52 = vld [vmem:[#allocation2 + $0x148] sm:$0xff] }
 0xca4   :  { %v962_v7 = vpop.permute.xlu2 %961 }
 0xcbc   :  { %v1025_v5 = vpop.permute.xlu1 %1024 }
 0xcbd   :  { %v1027_v4 = vpop.permute.xlu0 %1026 }
 0xcbe   :  { %1595 = vmatpush.xpose.msk.msra.mxu2 %vm139_vm8, %v1027_v4  ;;  %v1129_v4 = vld [vmem:[#allocation2 + $0x140] sm:$0xff] }
 0xcc1   :  { %1596 = vmatmul.msk.f32.vlgmr.msra.gmra.mxu2 %vm139_vm8, %v1025_v5 }
 0xcc5   :  { %v828_v6 = vpop.permute.xlu0 %827 }
 0xcc6   :  { %1586 = vmatpush.xpose.msk.msrb.mxu3 %vm139_vm8, %v828_v6 }
 0xcc9   :  { %1587 = vmatmul.msk.f32.vlgmr.msrb.gmra.mxu3 %vm139_vm8, %v1960_v39 }
 0xcca   :  { %1592 = vmatpush.xpose.msk.msra.mxu3 %vm139_vm8, %v962_v7 }
 0xcce   :  { %1118 = vmatpush.msrb.mxu3 %v1097_v56  ;;  %v1644_v56 = vld [vmem:[%s2129_s3 + $0x14] ss:$0 sm:$0xff] }
 0xcd0   :  { %1119 = vmatpush.msrb.mxu3 %v1096_v57 }
 0xcd1   :  { %1593 = vmatmul.msk.f32.vlgmr.msra.gmra.mxu3 %vm139_vm8, %v824_v1 }
 0xcd2   :  { %1120 = vmatpush.msrb.mxu3 %v1095_v58 }
 0xcd4   :  { %1121 = vmatpush.msrb.mxu3 %v1094_v59  ;;  %v1645_v59 = vld [vmem:[%s2129_s3 + $0x15] ss:$0 sm:$0xff] }
 0xce7   :  { %v920_v8 = vpop.xlane.xlu1 %919 }
 0xce8   :  { %v921_v9 = vsub.f32 %v916_v3, %v920_v8  ;;  %v1131_v3 = vld [vmem:[#allocation2 + $0x150] sm:$0xff] }
 0xce9   :  { %v1641_v8 = vld [vmem:[%s2129_s3 + $0x11] ss:$0 sm:$0xff] }
 0xcea   :  { %v922_v11 = vmul.f32 1.442695, %v921_v9 }
 0xcec   :  { %1688 = vpow2.f32 %v922_v11 }
 0xcf2   :  { %v1689_v14 = vpop.eup %1688 }
 0xcf3   :  { %v924_v18 = vsel %vm164_vm9, %v1689_v14, 0.0 }
 0xd44   :  { %v1049_v12 = vpop.f32.mrf.mxu2 }
 0xd45   :  { %v1050_v13 = vadd.f32 %v1049_v12, %v1854_v21  ;;  %v1135_v12 = vld [vmem:[#allocation2 + $0x168] sm:$0xff] }
 0xd46   :  { %1189 = vmatpush.msrb.mxu2 %v1135_v12 }
 0xd47   :  { %v1052_v53 = vsel %vm164_vm9, %v1050_v13, -inf }
 0xd48   :  { %1053 = vmax.xlane.f32.xlu0 %v1052_v53 }
 0xd4c   :  { %v850_v15 = vpop.f32.mrf.mxu3 }
 0xd4d   :  { %v851_v16 = vadd.f32 %v850_v15, %v1839_v63  ;;  %v1642_v15 = vld [vmem:[%s2129_s3 + $0x12] ss:$0 sm:$0xff] }
 0xd4f   :  { %v853_v17 = vsel %vm164_vm9, %v851_v16, -inf }
 0xd50   :  { %854 = vmax.xlane.f32.xlu2 %v853_v17  ;;  %925 = vadd.xlane.f32.xlu0 %v924_v18 }
 0xd54   :  { %v984_v19 = vpop.f32.mrf.mxu3 }
 0xd55   :  { %v985_v20 = vadd.f32 %v984_v19, %v1854_v21 }
 0xd57   :  { %v987_v22 = vsel %vm164_vm9, %v985_v20, -inf }
 0xd58   :  { %988 = vmax.xlane.f32.xlu1 %v987_v22 }
 0xd64   :  { %1063 = vrot.lane.b32.xlu0 %v824_v1, %s1754_s1 }
 0xd6c   :  { %998 = vrot.lane.b32.xlu0 %v824_v1, %s1752_s10 }
 0xd71   :  { %929 = vrot.lane.b32.xlu1 %v1960_v39, %s1754_s1 }
 0xdbb   :  { %v1054_v63 = vpop.xlane.xlu0 %1053 }
 0xdbc   :  { %v1055_v25 = vsub.f32 %v1050_v13, %v1054_v63  ;;  %v1134_v13 = vld [vmem:[#allocation2 + $0x160] sm:$0xff]  ;;  %v1643_v63 = vld [vmem:[%s2129_s3 + $0x13] ss:$0 sm:$0xff] }
 0xdbd   :  { %1190 = vmatpush.msrb.mxu2 %v1134_v13  ;;  %v1316_v13 = vld [vmem:[#allocation2 + $0x1c0] sm:$0xff] }
 0xdbe   :  { %v1056_v27 = vmul.f32 1.442695, %v1055_v25 }
 0xdc3   :  { %v855_v23 = vpop.xlane.xlu2 %854  ;;  %v926_v50 = vpop.xlane.xlu0 %925 }
 0xdc4   :  { %v856_v24 = vsub.f32 %v851_v16, %v855_v23 }
 0xdc6   :  { %v857_v26 = vmul.f32 1.442695, %v856_v24 }
 0xdc8   :  { %1690 = vpow2.f32 %v857_v26 }
 0xdc9   :  { %1692 = vpow2.f32 %v1056_v27 }
 0xdcb   :  { %v989_v28 = vpop.xlane.xlu1 %988 }
 0xdcc   :  { %v990_v21 = vsub.f32 %v985_v20, %v989_v28 }
 0xdce   :  { %v1691_v29 = vpop.eup %1690  ;;  %v991_v31 = vmul.f32 1.442695, %v990_v21 }
 0xdcf   :  { %v859_v30 = vsel %vm164_vm9, %v1691_v29, 0.0  ;;  %v1693_v33 = vpop.eup %1692 }
 0xdd0   :  { %860 = vadd.xlane.f32.xlu2 %v859_v30  ;;  %1694 = vpow2.f32 %v991_v31  ;;  %v1058_v34 = vsel %vm164_vm9, %v1693_v33, 0.0 }
 0xdd1   :  { %1696 = vrcp.f32 %v926_v50 }
 0xdd6   :  { %v1695_v35 = vpop.eup %1694  ;;  %v1064_v42 = vpop.permute.xlu0 %1063 }
 0xdd7   :  { %v993_v36 = vsel %vm164_vm9, %v1695_v35, 0.0  ;;  %v1697_v37 = vpop.eup %1696 }
 0xdd8   :  { %1059 = vadd.xlane.f32.xlu2 %v1058_v34  ;;  %v928_v38 = vmul.f32 %v1697_v37, %v1689_v14 }
 0xdde   :  { %v999_v51 = vpop.permute.xlu0 %998 }
 0xde0   :  { %994 = vadd.xlane.f32.xlu2 %v993_v36 }
 0xde3   :  { %v930_v41 = vpop.permute.xlu1 %929 }
 0xde4   :  { %950 = vmatpush.msrb.mxu1 %v930_v41 }
 0xde5   :  { %1591 = vmatmul.msk.f32.vlgmr.msrb.gmra.mxu1 %vm164_vm9, %v928_v38 }
 0xde6   :  { %1084 = vmatpush.msra.mxu1 %v1064_v42  ;;  %v1260_v42 = vld [vmem:[#allocation2 + $0x188] sm:$0xff] }
 0xde8   :  { %1281 = vmatpush.msrb.mxu1 %v1260_v42  ;;  %v1349_v42 = vld [vmem:[#allocation2 + $0x1d0] sm:$0xff] }
 0xdf8   :  { %864 = vrot.lane.b32.xlu2 %v1960_v39, %s1752_s10 }
 0xe43   :  { %v861_v40 = vpop.xlane.xlu2 %860 }
 0xe4b   :  { %v1060_v43 = vpop.xlane.xlu2 %1059 }
 0xe4c   :  { %1698 = vrcp.f32 %v1060_v43  ;;  %v1258_v43 = vld [vmem:[#allocation2 + $0x178] sm:$0xff] }
 0xe4d   :  { %1700 = vrcp.f32 %v861_v40 }
 0xe52   :  { %v1699_v44 = vpop.eup %1698 }
 0xe53   :  { %v1062_v45 = vmul.f32 %v1699_v44, %v1693_v33  ;;  %v995_v47 = vpop.xlane.xlu2 %994  ;;  %v1701_v46 = vpop.eup %1700  ;;  %v1257_v44 = vld [vmem:[#allocation2 + $0x170] sm:$0xff] }
 0xe54   :  { %1702 = vrcp.f32 %v995_v47  ;;  %v863_v48 = vmul.f32 %v1701_v46, %v1691_v29 }
 0xe55   :  { %1597 = vmatmul.msk.f32.vlgmr.msra.gmra.mxu1 %vm164_vm9, %v1062_v45 }
 0xe5a   :  { %v1703_v54 = vpop.eup %1702 }
 0xe5b   :  { %v865_v49 = vpop.permute.xlu2 %864  ;;  %v997_v55 = vmul.f32 %v1703_v54, %v1695_v35 }
 0xe5c   :  { %885 = vmatpush.msra.mxu0 %v865_v49 }
 0xe5d   :  { %1588 = vmatmul.msk.f32.vlgmr.msra.gmra.mxu0 %vm164_vm9, %v863_v48 }
 0xe5e   :  { %1019 = vmatpush.msrb.mxu0 %v999_v51 }
 0xe60   :  { %1156 = vmatpush.msra.mxu0 %v1132_v2 }
 0xe62   :  { %v952_v39 = vpop.f32.mrf.mxu1  ;;  %1157 = vmatpush.msra.mxu0 %v1131_v3 }
 0xe63   :  { %956 = vrot.lane.b32.xlu1 %v952_v39, %s1755_s14 }
 0xe64   :  { %1158 = vmatpush.msra.mxu0 %v1130_v52 }
 0xe65   :  { %1594 = vmatmul.msk.f32.vlgmr.msrb.gmra.mxu0 %vm164_vm9, %v997_v55 }
 0xe66   :  { %1159 = vmatpush.msra.mxu0 %v1129_v4 }
 0xed2   :  { %v1086_v60 = vpop.f32.mrf.mxu1 }
 0xed3   :  { %1090 = vrot.lane.b32.xlu0 %v1086_v60, %s1755_s14 }
 0xed5   :  { %v957_v61 = vpop.permute.xlu1 %956 }
 0xeda   :  { %v887_v0 = vpop.f32.mrf.mxu0 }
 0xedb   :  { %v959_v1 = vsel %vm139_vm8, %v887_v0, %v957_v61 }
 0xedc   :  { %1598 = vmatmul.msk.f32.vlgmr.msrb.gmra.mxu3 %vm40_vm0, %v959_v1 }
 0xee2   :  { %v1021_v5 = vpop.f32.mrf.mxu0 }
 0xf45   :  { %v1091_v6 = vpop.permute.xlu0 %1090 }
 0xf46   :  { %v1093_v7 = vsel %vm139_vm8, %v1021_v5, %v1091_v6 }
 0xf47   :  { %1599 = vmatmul.msk.f32.gmra.mxu3 %vm40_vm0, %v1093_v7 }
 0xf5f   :  { %v1123_v9 = vpop.f32.mrf.mxu3 }
 0xf60   :  { %v1124_v11 = vadd.f32 %v1641_v8, %v1123_v9 }
 0xf62   :  { %1600 = vmatmul.msk.f32.vlgmr.msra.gmra.mxu0 %vm40_vm0, %v1124_v11 }
 0xfca   :  { %v1126_v53 = vpop.f32.mrf.mxu3 }
 0xfcb   :  { %v1127_v14 = vadd.f32 %v1641_v8, %v1126_v53 }
 0xfcd   :  { %1601 = vmatmul.msk.f32.gmra.mxu0 %vm40_vm0, %v1127_v14 }
 0xfdf   :  { %v1161_v16 = vpop.f32.mrf.mxu0 }
 0xfe0   :  { %v1162_v17 = vadd.f32 %v1642_v15, %v1161_v16  ;;  %v1313_v16 = vld [vmem:[#allocation2 + $0x1a8] sm:$0xff] }
 0xfe2   :  { %v1167_v18 = vmax.f32 %v1162_v17, 0.0  ;;  %v1312_v17 = vld [vmem:[#allocation2 + $0x1a0] sm:$0xff] }
 0xfe4   :  { %1602 = vmatmul.msk.f32.vlgmr.msrb.gmra.mxu2 %vm139_vm8, %v1167_v18  ;;  %v1311_v18 = vld [vmem:[#allocation2 + $0x198] sm:$0xff] }
0x104a   :  { %v1164_v19 = vpop.f32.mrf.mxu0 }
0x104b   :  { %v1165_v20 = vadd.f32 %v1642_v15, %v1164_v19  ;;  %v1314_v15 = vld [vmem:[#allocation2 + $0x1b0] sm:$0xff] }
0x104c   :  { %v1310_v19 = vld [vmem:[#allocation2 + $0x190] sm:$0xff] }
0x104d   :  { %v1168_v22 = vmax.f32 %v1165_v20, 0.0  ;;  %v1646_v20 = vld [vmem:[%s2129_s3 + $0x16] ss:$0 sm:$0xff] }
0x104f   :  { %1603 = vmatmul.msk.f32.gmra.mxu2 %vm139_vm8, %v1168_v22 }
0x1067   :  { %v1192_v23 = vpop.f32.mrf.mxu2 }
0x1068   :  { %v1198_v24 = vadd.f32 %v1192_v23, %v1124_v11  ;;  %v1317_v11 = vld [vmem:[#allocation2 + $0x1c8] sm:$0xff] }
0x1069   :  { %1334 = vmatpush.msra.mxu3 %v1317_v11 }
0x106a   :  { %v1201_v25 = vadd.f32 %v1643_v63, %v1198_v24 }
0x106b   :  { %1335 = vmatpush.msra.mxu3 %v1316_v13 }
0x106c   :  { %v1203_v26 = vadd.f32 %v1201_v25, %v1951_v32 }
0x106e   :  { %v1207_v27 = vsel %vm40_vm0, %v1203_v26, 0.0 }
0x106f   :  { %1208 = vadd.xlane.f32.xlu1 %v1207_v27 }
0x10d2   :  { %v1195_v28 = vpop.f32.mrf.mxu2 }
0x10d3   :  { %v1199_v29 = vadd.f32 %v1195_v28, %v1127_v14  ;;  %v1315_v14 = vld [vmem:[#allocation2 + $0x1b8] sm:$0xff] }
0x10d4   :  { %1336 = vmatpush.msra.mxu3 %v1315_v14 }
0x10d5   :  { %v1202_v21 = vadd.f32 %v1643_v63, %v1199_v29 }
0x10d6   :  { %1337 = vmatpush.msra.mxu3 %v1314_v15 }
0x10d7   :  { %v1204_v30 = vadd.f32 %v1202_v21, %v1971_v62  ;;  %v1259_v62 = vld [vmem:[#allocation2 + $0x180] sm:$0xff] }
0x10d8   :  { %1282 = vmatpush.msrb.mxu1 %v1259_v62  ;;  %1338 = vmatpush.msra.mxu3 %v1313_v16 }
0x10d9   :  { %v1210_v31 = vsel %vm40_vm0, %v1204_v30, 0.0 }
0x10da   :  { %1211 = vadd.xlane.f32.xlu0 %v1210_v31  ;;  %1283 = vmatpush.msrb.mxu1 %v1258_v43  ;;  %v1352_v31 = vld [vmem:[#allocation2 + $0x1e8] sm:$0xff] }
0x10db   :  { %1339 = vmatpush.msra.mxu3 %v1312_v17  ;;  %1376 = vmatpush.msrb.mxu0 %v1352_v31  ;;  %v1650_v31 = vld [vmem:[%s2129_s3 + $0x1a] ss:$0 sm:$0xff] }
0x10dc   :  { %1284 = vmatpush.msrb.mxu1 %v1257_v44 }
0x10dd   :  { %1340 = vmatpush.msra.mxu3 %v1311_v18 }
0x10df   :  { %1341 = vmatpush.msra.mxu3 %v1310_v19 }
0x10e2   :  { %v1209_v33 = vpop.xlane.xlu1 %1208 }
0x10e3   :  { %v1213_v50 = vmul.f32 %v1209_v33, %v1797_v10  ;;  %v1351_v33 = vld [vmem:[#allocation2 + $0x1e0] sm:$0xff] }
0x10e4   :  { %1377 = vmatpush.msrb.mxu0 %v1351_v33 }
0x10e5   :  { %v1215_v34 = vsub.f32 %v1203_v26, %v1213_v50 }
0x10e7   :  { %v1217_v35 = vmul.f32 %v1215_v34, %v1215_v34 }
0x10e9   :  { %v1219_v36 = vsel %vm40_vm0, %v1217_v35, 0.0 }
0x10ea   :  { %1220 = vadd.xlane.f32.xlu2 %v1219_v36 }
0x114d   :  { %v1212_v32 = vpop.xlane.xlu0 %1211 }
0x114e   :  { %v1214_v37 = vmul.f32 %v1212_v32, %v1797_v10 }
0x1150   :  { %v1216_v38 = vsub.f32 %v1204_v30, %v1214_v37 }
0x1152   :  { %v1218_v41 = vmul.f32 %v1216_v38, %v1216_v38 }
0x1154   :  { %v1222_v40 = vsel %vm40_vm0, %v1218_v41, 0.0  ;;  %v1350_v41 = vld [vmem:[#allocation2 + $0x1d8] sm:$0xff] }
0x1155   :  { %1223 = vadd.xlane.f32.xlu1 %v1222_v40  ;;  %1378 = vmatpush.msrb.mxu0 %v1350_v41 }
0x1157   :  { %1379 = vmatpush.msrb.mxu0 %v1349_v42 }
0x115d   :  { %v1221_v45 = vpop.xlane.xlu2 %1220 }
0x115e   :  { %v1225_v47 = vmul.f32 %v1221_v45, %v1797_v10  ;;  %v1647_v45 = vld [vmem:[%s2129_s3 + $0x17] ss:$0 sm:$0xff] }
0x1160   :  { %v1227_v46 = vadd.f32 1e-12, %v1225_v47 }
0x1162   :  { %1704 = vrsqrt.f32 %v1227_v46  ;;  %vm1235_vm10 = vweird.f32 %v1227_v46 }
0x1168   :  { %v1705_v48 = vpop.eup %1704 }
0x1169   :  { %v1230_v49 = vmul.f32 %v1705_v48, %v1227_v46  ;;  %vm1236_vm9 = vweird.f32 %v1705_v48 }
0x116a   :  { %vm1237_vm11 = vmor %vm1235_vm10, %vm1236_vm9 }
0x116b   :  { %v1231_v51 = vmul.f32 %v1705_v48, %v1230_v49  ;;  %v1354_v49 = vld [vmem:[#allocation2 + $0x1f0] sm:$0xff] }
0x116d   :  { %v1232_v54 = vmul.f32 0.5, %v1231_v51 }
0x116f   :  { %v1233_v39 = vsub.f32 1.5, %v1232_v54 }
0x1171   :  { %v1234_v55 = vmul.f32 %v1705_v48, %v1233_v39  ;;  %v1648_v39 = vld [vmem:[%s2129_s3 + $0x18] ss:$0 sm:$0xff] }
0x1173   :  { %v1238_v57 = vsel %vm1237_vm11, %v1705_v48, %v1234_v55  ;;  %v1355_v48 = vld [vmem:[#allocation2 + $0x1f8] sm:$0xff] }
0x1174   :  { %v1249_v58 = vmul.f32 %v1238_v57, %v1215_v34  ;;  %1409 = vmatpush.msra.mxu2 %v1355_v48  ;;  %v1514_v48 = vld [vmem:[%s2130_s4 + $0x20] sm:$0xff] }
0x1176   :  { %v1252_v60 = vmul.f32 %v1644_v56, %v1249_v58  ;;  %1410 = vmatpush.msra.mxu2 %v1354_v49 }
0x1178   :  { %v2043_v61 = vadd.f32 %v1645_v59, %v1252_v60 }
0x117a   :  { %1604 = vmatmul.msk.f32.vlgmr.msrb.gmra.mxu1 %vm40_vm0, %v2043_v61 }
0x11c8   :  { %v1224_v0 = vpop.xlane.xlu1 %1223 }
0x11c9   :  { %v1226_v1 = vmul.f32 %v1224_v0, %v1797_v10  ;;  %v1649_v0 = vld [vmem:[%s2129_s3 + $0x19] ss:$0 sm:$0xff] }
0x11cb   :  { %v1228_v2 = vadd.f32 1e-12, %v1226_v1 }
0x11cd   :  { %1706 = vrsqrt.f32 %v1228_v2  ;;  %vm1245_vm14 = vweird.f32 %v1228_v2 }
0x11d3   :  { %v1707_v3 = vpop.eup %1706 }
0x11d4   :  { %v1240_v52 = vmul.f32 %v1707_v3, %v1228_v2  ;;  %vm1246_vm12 = vweird.f32 %v1707_v3 }
0x11d5   :  { %vm1247_vm15 = vmor %vm1245_vm14, %vm1246_vm12 }
0x11d6   :  { %v1241_v4 = vmul.f32 %v1707_v3, %v1240_v52 }
0x11d8   :  { %v1242_v5 = vmul.f32 0.5, %v1241_v4 }
0x11da   :  { %v1243_v6 = vsub.f32 1.5, %v1242_v5 }
0x11dc   :  { %v1244_v7 = vmul.f32 %v1707_v3, %v1243_v6 }
0x11de   :  { %v1248_v8 = vsel %vm1247_vm15, %v1707_v3, %v1244_v7 }
0x11df   :  { %v1250_v9 = vmul.f32 %v1248_v8, %v1216_v38 }
0x11e1   :  { %v1253_v12 = vmul.f32 %v1644_v56, %v1250_v9 }
0x11e3   :  { %v2048_v53 = vadd.f32 %v1645_v59, %v1253_v12 }
0x11e5   :  { %1605 = vmatmul.msk.f32.gmra.mxu1 %vm40_vm0, %v2048_v53 }
0x11f7   :  { %v1286_v22 = vpop.f32.mrf.mxu1 }
0x11f8   :  { %v1287_v63 = vadd.f32 %v1646_v20, %v1286_v22  ;;  %v1478_v22 = vld [vmem:[%s2130_s4 + $0x8] sm:$0xff] }
0x11fa   :  { %v1294_v23 = vmul.f32 0.044715, %v1287_v63  ;;  %v1292_v29 = vmul.f32 0.5, %v1287_v63 }
0x11fc   :  { %v1296_v24 = vmul.f32 %v1294_v23, %v1287_v63 }
0x11fe   :  { %v1298_v25 = vmul.f32 %v1296_v24, %v1287_v63 }
0x1200   :  { %v1300_v26 = vadd.f32 %v1298_v25, %v1287_v63  ;;  %v1477_v63 = vld [vmem:[%s2130_s4] sm:$0xff] }
0x1202   :  { %v1302_v27 = vmul.f32 0.7978846, %v1300_v26 }
0x1204   :  { %1708 = vtanh.f32 %v1302_v27 }
0x120a   :  { %v1709_v28 = vpop.eup %1708 }
0x120b   :  { %v1306_v21 = vadd.f32 1.0, %v1709_v28 }
0x120d   :  { %v1308_v30 = vmul.f32 %v1306_v21, %v1292_v29 }
0x120f   :  { %1606 = vmatmul.msk.f32.vlgmr.msra.gmra.mxu3 %vm632_vm13, %v1308_v30 }
0x1262   :  { %v1289_v50 = vpop.f32.mrf.mxu1 }
0x1263   :  { %v1290_v34 = vadd.f32 %v1646_v20, %v1289_v50  ;;  %v1479_v20 = vld [vmem:[%s2130_s4 + $0x10] sm:$0xff] }
0x1265   :  { %v1295_v35 = vmul.f32 0.044715, %v1290_v34  ;;  %v1293_v62 = vmul.f32 0.5, %v1290_v34 }
0x1267   :  { %v1297_v36 = vmul.f32 %v1295_v35, %v1290_v34 }
0x1269   :  { %v1299_v32 = vmul.f32 %v1297_v36, %v1290_v34 }
0x126b   :  { %v1301_v37 = vadd.f32 %v1299_v32, %v1290_v34  ;;  %v1651_v34 = vld [vmem:[%s2129_s3 + $0x1b] ss:$0 sm:$0xff] }
0x126d   :  { %v1303_v38 = vmul.f32 0.7978846, %v1301_v37 }
0x126f   :  { %1710 = vtanh.f32 %v1303_v38 }
0x1275   :  { %v1711_v40 = vpop.eup %1710 }
0x1276   :  { %v1307_v43 = vadd.f32 1.0, %v1711_v40 }
0x1278   :  { %v1309_v44 = vmul.f32 %v1307_v43, %v1293_v62 }
0x127a   :  { %1607 = vmatmul.msk.f32.gmra.mxu3 %vm632_vm13, %v1309_v44  ;;  %v1517_v44 = vld [vmem:[%s2130_s4 + $0x38] sm:$0xff] }
0x127b   :  { %1538 = vmatpush.msrb.mxu3 %v1517_v44 }
0x1292   :  { %v1343_v47 = vpop.f32.mrf.mxu3 }
0x1293   :  { %v1344_v46 = vadd.f32 %v1647_v45, %v1343_v47 }
0x1295   :  { %1608 = vmatmul.msk.f32.vlgmr.msrb.gmra.mxu0 %vm40_vm0, %v1344_v46 }
0x12fd   :  { %v1346_v51 = vpop.f32.mrf.mxu3 }
0x12fe   :  { %v1347_v54 = vadd.f32 %v1647_v45, %v1346_v51  ;;  %v1516_v45 = vld [vmem:[%s2130_s4 + $0x30] sm:$0xff] }
0x12ff   :  { %1539 = vmatpush.msrb.mxu3 %v1516_v45 }
0x1300   :  { %1609 = vmatmul.msk.f32.gmra.mxu0 %vm40_vm0, %v1347_v54 }
0x1312   :  { %v1381_v55 = vpop.f32.mrf.mxu0 }
0x1313   :  { %v1382_v56 = vadd.f32 %v1648_v39, %v1381_v55 }
0x1315   :  { %v1387_v57 = vmax.f32 %v1382_v56, 0.0 }
0x1317   :  { %1610 = vmatmul.msk.f32.vlgmr.msra.gmra.mxu2 %vm139_vm8, %v1387_v57 }
0x137d   :  { %v1384_v58 = vpop.f32.mrf.mxu0 }
0x137e   :  { %v1385_v59 = vadd.f32 %v1648_v39, %v1384_v58  ;;  %v1652_v39 = vld [vmem:[%s2129_s3 + $0x2] ss:$0 sm:$0xff] }
0x1380   :  { %v1388_v60 = vmax.f32 %v1385_v59, 0.0 }
0x1382   :  { %1611 = vmatmul.msk.f32.gmra.mxu2 %vm139_vm8, %v1388_v60 }
0x139a   :  { %v1412_v1 = vpop.f32.mrf.mxu2 }
0x139b   :  { %v1418_v2 = vadd.f32 %v1412_v1, %v1344_v46 }
0x139d   :  { %v1421_v3 = vadd.f32 %v1649_v0, %v1418_v2 }
0x139f   :  { %v1423_v52 = vadd.f32 %v1421_v3, %v2043_v61 }
0x13a1   :  { %v1427_v4 = vsel %vm40_vm0, %v1423_v52, 0.0 }
0x13a2   :  { %1428 = vadd.xlane.f32.xlu0 %v1427_v4 }
0x1405   :  { %v1415_v5 = vpop.f32.mrf.mxu2 }
0x1406   :  { %v1419_v6 = vadd.f32 %v1415_v5, %v1347_v54 }
0x1408   :  { %v1422_v7 = vadd.f32 %v1649_v0, %v1419_v6  ;;  %v1653_v0 = vld [vmem:[%s2129_s3 + $0x3] ss:$0 sm:$0xff] }
0x140a   :  { %v1424_v8 = vadd.f32 %v1422_v7, %v2048_v53  ;;  %v1480_v53 = vld [vmem:[%s2130_s4 + $0x18] sm:$0xff] }
0x140b   :  { %1501 = vmatpush.msra.mxu1 %v1480_v53 }
0x140c   :  { %v1430_v9 = vsel %vm40_vm0, %v1424_v8, 0.0 }
0x140d   :  { %1431 = vadd.xlane.f32.xlu1 %v1430_v9  ;;  %1502 = vmatpush.msra.mxu1 %v1479_v20 }
0x140f   :  { %1503 = vmatpush.msra.mxu1 %v1478_v22 }
0x1411   :  { %1504 = vmatpush.msra.mxu1 %v1477_v63 }
0x1415   :  { %v1429_v11 = vpop.xlane.xlu0 %1428 }
0x1416   :  { %v1433_v12 = vmul.f32 %v1429_v11, %v1797_v10 }
0x1418   :  { %v1435_v13 = vsub.f32 %v1423_v52, %v1433_v12 }
0x141a   :  { %v1437_v14 = vmul.f32 %v1435_v13, %v1435_v13 }
0x141c   :  { %v1439_v15 = vsel %vm40_vm0, %v1437_v14, 0.0 }
0x141d   :  { %1440 = vadd.xlane.f32.xlu2 %v1439_v15 }
0x1480   :  { %v1432_v61 = vpop.xlane.xlu1 %1431 }
0x1481   :  { %v1434_v16 = vmul.f32 %v1432_v61, %v1797_v10 }
0x1483   :  { %v1436_v17 = vsub.f32 %v1424_v8, %v1434_v16 }
0x1485   :  { %v1438_v18 = vmul.f32 %v1436_v17, %v1436_v17 }
0x1487   :  { %v1442_v19 = vsel %vm40_vm0, %v1438_v18, 0.0 }
0x1488   :  { %1443 = vadd.xlane.f32.xlu0 %v1442_v19 }
0x1490   :  { %v1441_v23 = vpop.xlane.xlu2 %1440 }
0x1491   :  { %v1445_v24 = vmul.f32 %v1441_v23, %v1797_v10 }
0x1493   :  { %v1447_v25 = vadd.f32 1e-12, %v1445_v24 }
0x1495   :  { %1712 = vrsqrt.f32 %v1447_v25  ;;  %vm1455_vm13 = vweird.f32 %v1447_v25 }
0x149b   :  { %v1713_v26 = vpop.eup %1712 }
0x149c   :  { %v1450_v27 = vmul.f32 %v1713_v26, %v1447_v25  ;;  %vm1456_vm8 = vweird.f32 %v1713_v26 }
0x149d   :  { %vm1457_vm1 = vmor %vm1455_vm13, %vm1456_vm8 }
0x149e   :  { %v1451_v28 = vmul.f32 %v1713_v26, %v1450_v27 }
0x14a0   :  { %v1452_v29 = vmul.f32 0.5, %v1451_v28 }
0x14a2   :  { %v1453_v21 = vsub.f32 1.5, %v1452_v29 }
0x14a4   :  { %v1454_v30 = vmul.f32 %v1713_v26, %v1453_v21 }
0x14a6   :  { %v1458_v33 = vsel %vm1457_vm1, %v1713_v26, %v1454_v30 }
0x14a7   :  { %v1469_v50 = vmul.f32 %v1458_v33, %v1435_v13 }
0x14a9   :  { %v1472_v35 = vmul.f32 %v1650_v31, %v1469_v50 }
0x14ab   :  { %v1475_v36 = vadd.f32 %v1651_v34, %v1472_v35 }
0x14ad   :  { %1612 = vmatmul.msk.f32.vlgmr.msra.gmra.mxu1 %vm40_vm0, %v1475_v36 }
0x14fb   :  { %v1444_v32 = vpop.xlane.xlu0 %1443 }
0x14fc   :  { %v1446_v37 = vmul.f32 %v1444_v32, %v1797_v10  ;;  %v1515_v10 = vld [vmem:[%s2130_s4 + $0x28] sm:$0xff] }
0x14fd   :  { %1540 = vmatpush.msrb.mxu3 %v1515_v10 }
0x14fe   :  { %v1448_v38 = vadd.f32 1e-12, %v1446_v37 }
0x14ff   :  { %1541 = vmatpush.msrb.mxu3 %v1514_v48 }
0x1500   :  { %1714 = vrsqrt.f32 %v1448_v38  ;;  %vm1465_vm3 = vweird.f32 %v1448_v38 }
0x1506   :  { %v1715_v41 = vpop.eup %1714 }
0x1507   :  { %v1460_v42 = vmul.f32 %v1715_v41, %v1448_v38  ;;  %vm1466_vm2 = vweird.f32 %v1715_v41 }
0x1508   :  { %vm1467_vm4 = vmor %vm1465_vm3, %vm1466_vm2 }
0x1509   :  { %v1461_v40 = vmul.f32 %v1715_v41, %v1460_v42 }
0x150b   :  { %v1462_v62 = vmul.f32 0.5, %v1461_v40 }
0x150d   :  { %v1463_v43 = vsub.f32 1.5, %v1462_v62 }
0x150f   :  { %v1464_v47 = vmul.f32 %v1715_v41, %v1463_v43 }
0x1511   :  { %v1468_v46 = vsel %vm1467_vm4, %v1715_v41, %v1464_v47 }
0x1512   :  { %v1470_v49 = vmul.f32 %v1468_v46, %v1436_v17 }
0x1514   :  { %v1473_v51 = vmul.f32 %v1650_v31, %v1470_v49 }
0x1516   :  { %v1476_v54 = vadd.f32 %v1651_v34, %v1473_v51 }
0x1518   :  { %1613 = vmatmul.msk.f32.gmra.mxu1 %vm40_vm0, %v1476_v54 }
0x152a   :  { %v1506_v55 = vpop.f32.mrf.mxu1 }
0x152b   :  { %v1507_v56 = vadd.f32 %v1652_v39, %v1506_v55 }
0x152d   :  { %1716 = vtanh.f32 %v1507_v56 }
0x1533   :  { %v1717_v57 = vpop.eup %1716 }
0x1534   :  { %1614 = vmatmul.msk.f32.vlgmr.msrb.gmra.mxu3 %vm40_vm0, %v1717_v57 }
0x1595   :  { %v1509_v58 = vpop.f32.mrf.mxu1 }
0x1596   :  { %v1510_v59 = vadd.f32 %v1652_v39, %v1509_v58 }
0x1598   :  { %1718 = vtanh.f32 %v1510_v59 }
0x159e   :  { %v1719_v60 = vpop.eup %1718 }
0x159f   :  { %1615 = vmatmul.msk.f32.gmra.mxu3 %vm40_vm0, %v1719_v60 }
0x15b7   :  { %v1543_v1 = vpop.f32.mrf.mxu3 }
0x15b8   :  { %v1544_v2 = vadd.f32 %v1653_v0, %v1543_v1 }
0x15ba   :  { %1549 = vst [vmem:[%s2131_s5] sm:$0xff] %v1544_v2 }
0x1622   :  { %v1546_v3 = vpop.f32.mrf.mxu3 }
0x1623   :  { %v1547_v52 = vadd.f32 %v1653_v0, %v1546_v3 }
0x1625   :  { %1550 = vst [vmem:[%s2131_s5 + $0x8] sm:$0xff] %v1547_v52 }
0x1626   :  { %1555 = vsyncpa [#allocation3], 1 }

</bundles_post_ra>
